<compile_context>
chip_gen: v7x
topology: tpu7x:2x2x1
jax: 0.10.0
libtpu: 0.0.40
codegen_flags: <defaults>
</compile_context>

<pallas_src>
import functools

import jax
import jax.numpy as jnp
from jax import lax
from jax.experimental import pallas as pl
from jax.experimental.pallas import tpu as pltpu


def _round_up(a, m):
    return (a + m - 1) // m * m


def _vmem_limit_bytes():
    try:
        cap = pltpu.get_tpu_info().vmem_capacity_bytes
    except Exception:
        cap = 64 * 1024 * 1024          # conservative (v7x per-TC VMEM)
    return int(min(cap * 3 // 4, 96 * 1024 * 1024))


def content_kernel(x_ref, mask_ref, eps_ref,
                   wcat_ref, w2_ref, b1_ref, b2_ref,
                   wmu_ref, bmu_ref, wls_ref, bls_ref,
                   whh_ref, br_ref, bz_ref, bxn_ref, bhn_ref,
                   wo_ref, bo_ref,
                   out_ref, hn_ref, theta_ref,
                   xr_ref, xz_ref, xn_ref, g_ref):
    """One batch tile (Bt elements) per grid step.

    Ref shapes (HP = round_up(H, 128)):
      x_ref    (1, L*Bt, V) bf16   rows time-major: row = t*Bt + b
      mask_ref (1, L, Bt) f32      eps_ref (1, Bt, T) f32
      wcat_ref (V, 4*HP+T) bf16 = [dense1 | We@Wih_r | We@Wih_z | We@Wih_n | B]
      w2 (H,H) bf16   b1/b2 (1,H) f32   wmu/wls (H,T) bf16   bmu/bls (1,T) f32
      whh_ref (H, 3*HP) bf16 = [Whr | Whz | Whn] (each gate padded to HP cols)
      br/bz/bxn/bhn (1,H) f32   wo (1,H) f32   bo (1,1) f32
      out_ref (1, L, Bt)  hn_ref (1, Bt, H)  theta_ref (1, Bt, T)
      xr/xz/xn/g scratch (L, Bt, H) bf16
    """
    L, Bt = mask_ref.shape[1], mask_ref.shape[2]
    H = br_ref.shape[1]
    HP = whh_ref.shape[1] // 3
    T = wmu_ref.shape[1]

    x = x_ref[0]                       # (L*Bt, V) bf16
    m3 = mask_ref[0]                   # (L, Bt)   f32
    eps = eps_ref[0]                   # (Bt, T)   f32

    # ---- ONE fused bf16 MXU pass over x: [dense1 | GRU input (r|z|n) | B] ----
    xc = jnp.dot(x, wcat_ref[...], preferred_element_type=jnp.float32)   # (L*Bt, 4HP+T)

    # ---- encoder MLP + theta ----
    h1 = jnp.maximum(xc[:, :H] + b1_ref[...], 0.0)                        # (L*Bt, H)
    h2 = jnp.maximum(
        jnp.dot(h1.astype(jnp.bfloat16), w2_ref[...],
                preferred_element_type=jnp.float32) + b2_ref[...], 0.0)   # (L*Bt, H)
    # (unmasked mean over the sequence, exactly as in the PyTorch model)
    h2m = jnp.mean(h2.reshape(L, Bt, H), axis=0).astype(jnp.bfloat16)     # (Bt, H)
    mu = jnp.dot(h2m, wmu_ref[...], preferred_element_type=jnp.float32) + bmu_ref[...]
    log_sigma = jnp.dot(h2m, wls_ref[...],
                        preferred_element_type=jnp.float32) + bls_ref[...]

    # reparameterization + softmax over topics (ThetaLayer)
    z = mu + jnp.exp(0.5 * log_sigma) * eps                               # (Bt, T)
    z = z - jnp.max(z, axis=-1, keepdims=True)
    ez = jnp.exp(z)
    theta = ez / jnp.sum(ez, axis=-1, keepdims=True)                      # (Bt, T)
    theta_ref[0] = theta
    # TODO(synk): klterm is a stateful side effect of ThetaLayer (not a forward output);
    # it is intentionally not materialized here.

    # ---- topic context: mean over topics of (B(x) * theta), lane-dense (L, Bt) ----
    b_out = xc[:, 4 * HP:].reshape(L, Bt, T)
    context = jnp.mean(b_out * theta[None], axis=-1)                      # (L, Bt)

    # ---- GRU x-side precompute, per-gate & lane-aligned, biases folded ----
    xc3 = xc.reshape(L, Bt, 4 * HP + T)
    mex = m3[:, :, None]                                   # mask multiplies `embedded`
    xr_ref[...] = (xc3[..., HP:HP + H] * mex + br_ref[...]).astype(xr_ref.dtype)
    xz_ref[...] = (xc3[..., 2 * HP:2 * HP + H] * mex + bz_ref[...]).astype(xz_ref.dtype)
    xn_ref[...] = (xc3[..., 3 * HP:3 * HP + H] * mex + bxn_ref[...]).astype(xn_ref.dtype)

    bhn = bhn_ref[...]                                                    # (1, H)

    def step(t, h):
        # ONE fused (Bt,H)@(H,3*HP) bf16 matmul per timestep; gate slices 128-aligned.
        hh = jnp.dot(h.astype(jnp.bfloat16), whh_ref[...],
                     preferred_element_type=jnp.float32)                  # (Bt, 3*HP)
        r = jax.nn.sigmoid(xr_ref[t].astype(jnp.float32) + hh[:, :H])
        zg = jax.nn.sigmoid(xz_ref[t].astype(jnp.float32) + hh[:, HP:HP + H])
        n = jnp.tanh(xn_ref[t].astype(jnp.float32)
                     + r * (hh[:, 2 * HP:2 * HP + H] + bhn))
        h_new = (1.0 - zg) * n + zg * h
        g_ref[t] = h_new.astype(g_ref.dtype)
        return h_new

    h0 = jnp.zeros((Bt, H), jnp.float32)
    h_last = lax.fori_loop(0, L, step, h0, unroll=min(8, L))
    hn_ref[0] = h_last                                                    # (Bt, H)

    # ---- output head: sigmoid(Linear(gru_out) + context) * mask + 1e-6, lane-dense ----
    g = g_ref[...].astype(jnp.float32)                                    # (L, Bt, H)
    dense = jnp.sum(g * wo_ref[...], axis=-1) + bo_ref[...]               # (L, Bt)
    out_ref[0] = jax.nn.sigmoid(dense + context) * m3 + 1e-6


@functools.partial(jax.jit, static_argnames=("block_b",))
def content_model_forward(params, x, mask, eps, block_b=None):
    """x: (B, L, V), mask: (B, L), eps: (B, T) pre-sampled N(0,1) noise."""
    B, L, V = x.shape
    H = params["whh"].shape[0]
    T = params["wb"].shape[1]
    HP = _round_up(H, 128)            # per-gate column stride (lane-aligned)
    C = 4 * HP + T

    vmem_limit = _vmem_limit_bytes()

    # ---- batch-tile selection: large MXU M for the serial GRU, sized to per-chip VMEM ----
    if block_b is None:
        Bt = min(128, _round_up(B, 8))
        if Bt > 8 and (B + Bt - 1) // Bt < 2:
            Bt = max(8, _round_up((B + 1) // 2, 8))   # >=2 tiles -> v7x's 2nd TC has work
        wbytes = 4 * (V * C + H * 3 * HP + 3 * H * H + 2 * H * T)   # bf16 x 2 buffers

        def tile_bytes(bt):
            lb = L * bt
            return (2 * lb * V * 2          # x stream (bf16, double-buffered)
                    + lb * C * 4            # fused-matmul intermediate (f32)
                    + 4 * lb * H * 2        # xr/xz/xn/g scratch (bf16)
                    + 3 * lb * 4            # mask / out tiles
                    + wbytes)

        budget = int(vmem_limit * 0.6)
        while Bt > 8 and tile_bytes(Bt) > budget:
            Bt -= 8
    else:
        Bt = max(8, _round_up(block_b, 8))

    nb = (B + Bt - 1) // Bt
    B_pad = nb * Bt
    pad = B_pad - B

    f32 = jnp.float32
    xb = x.astype(jnp.bfloat16)               # cast BEFORE the time-major transpose
    mf = mask.astype(f32)
    ef = eps.astype(f32)
    if pad:
        xb = jnp.pad(xb, ((0, pad), (0, 0), (0, 0)))
        mf = jnp.pad(mf, ((0, pad), (0, 0)))
        ef = jnp.pad(ef, ((0, pad), (0, 0)))

    # Time-major tiles: row r = t*Bt + b_local inside each batch tile.
    x_p = xb.reshape(nb, Bt, L, V).transpose(0, 2, 1, 3).reshape(nb, L * Bt, V)
    m_p = mf.reshape(nb, Bt, L).transpose(0, 2, 1)                 # (nb, L, Bt)
    e_p = ef.reshape(nb, Bt, T)

    # ---- weight prep (cheap XLA work outside the kernel) ----
    def pad_cols(w):
        return jnp.pad(w, ((0, 0), (0, HP - w.shape[1])))

    wgru = jnp.dot(params["we"], params["wih"])        # fold embed into GRU input proj
    wcat = jnp.concatenate(
        [pad_cols(params["w1"]),
         pad_cols(wgru[:, :H]), pad_cols(wgru[:, H:2 * H]), pad_cols(wgru[:, 2 * H:]),
         params["wb"]], axis=1).astype(jnp.bfloat16)   # (V, 4*HP + T)

    whh = params["whh"]
    whh_cat = jnp.concatenate(
        [pad_cols(whh[:, :H]), pad_cols(whh[:, H:2 * H]), pad_cols(whh[:, 2 * H:])],
        axis=1).astype(jnp.bfloat16)                   # (H, 3*HP)

    bih, bhh = params["bih"], params["bhh"]
    br = bih[:, :H] + bhh[:, :H]
    bz = bih[:, H:2 * H] + bhh[:, H:2 * H]
    bxn = bih[:, 2 * H:]
    bhn = bhh[:, 2 * H:]

    weights = [wcat,
               params["w2"].astype(jnp.bfloat16), params["b1"], params["b2"],
               params["wmu"].astype(jnp.bfloat16), params["bmu"],
               params["wls"].astype(jnp.bfloat16), params["bls"],
               whh_cat, br, bz, bxn, bhn,
               params["wo"], params["bo"]]

    def batched(shape):
        nd = len(shape)
        return pl.BlockSpec(shape, lambda i, _nd=nd: (i,) + (0,) * (_nd - 1))

    def replicated(shape):
        zeros = (0,) * len(shape)
        return pl.BlockSpec(shape, lambda i, _z=zeros: _z)

    # TODO(synk): for large vocab V, wcat should be K-tiled over an extra "arbitrary" grid
    # axis (or left in HBM with memory_space=pl.ANY + manual DMA) and the grid-invariant
    # weights single-buffered (pl.Buffered(1)); unnecessary at these sizes.
    in_specs = ([batched((1, L * Bt, V)),
                 batched((1, L, Bt)),
                 batched((1, Bt, T))]
                + [replicated(w.shape) for w in weights])

    out_shape = (jax.ShapeDtypeStruct((nb, L, Bt), jnp.float32),   # out (time-major, lane-dense)
                 jax.ShapeDtypeStruct((nb, Bt, H), jnp.float32),   # h_n
                 jax.ShapeDtypeStruct((nb, Bt, T), jnp.float32))   # theta
    out_specs = (batched((1, L, Bt)),
                 batched((1, Bt, H)),
                 batched((1, Bt, T)))

    out_p, hn_p, theta_p = pl.pallas_call(
        content_kernel,
        out_shape=out_shape,
        grid=(nb,),
        in_specs=in_specs,
        out_specs=out_specs,
        scratch_shapes=[pltpu.VMEM((L, Bt, H), jnp.bfloat16),   # x->r gate precompute
                        pltpu.VMEM((L, Bt, H), jnp.bfloat16),   # x->z gate precompute
                        pltpu.VMEM((L, Bt, H), jnp.bfloat16),   # x->n gate precompute
                        pltpu.VMEM((L, Bt, H), jnp.bfloat16)],  # GRU hidden states
        compiler_params=pltpu.CompilerParams(
            dimension_semantics=("parallel",),
            vmem_limit_bytes=vmem_limit),
    )(x_p, m_p, e_p, *weights)

    out = out_p.transpose(0, 2, 1).reshape(B_pad, L)[:B]
    h_n = hn_p.reshape(B_pad, H)[:B][None]       # PyTorch GRU h_n layout (1, B, H)
    theta = theta_p.reshape(B_pad, T)[:B]
    return out, h_n, theta


def content_model_reference(params, x, mask, eps):
    """Pure-JAX f32 reference with identical semantics (for a tolerance check)."""
    H = params["whh"].shape[0]
    embedded = (x @ params["we"]) * mask[..., None]
    wih, bih, whh, bhh = params["wih"], params["bih"], params["whh"], params["bhh"]

    def gru_step(h, xt):
        gi = xt @ wih + bih[0]
        gh = h @ whh + bhh[0]
        r = jax.nn.sigmoid(gi[:, :H] + gh[:, :H])
        z = jax.nn.sigmoid(gi[:, H:2 * H] + gh[:, H:2 * H])
        n = jnp.tanh(gi[:, 2 * H:] + r * gh[:, 2 * H:])
        h_new = (1.0 - z) * n + z * h
        return h_new, h_new

    B = x.shape[0]
    h_last, hs = lax.scan(gru_step, jnp.zeros((B, H), jnp.float32),
                          jnp.swapaxes(embedded, 0, 1))
    gru_out = jnp.swapaxes(hs, 0, 1)
    h1 = jax.nn.relu(x @ params["w1"] + params["b1"])
    h2 = jax.nn.relu(h1 @ params["w2"] + params["b2"])
    h2m = h2.mean(axis=1)
    mu = h2m @ params["wmu"] + params["bmu"]
    log_sigma = h2m @ params["wls"] + params["bls"]
    z = mu + jnp.exp(0.5 * log_sigma) * eps
    theta = jax.nn.softmax(z, axis=1)
    b_out = x @ params["wb"]
    context = (b_out * theta[:, None, :]).mean(axis=-1)
    dense_out = (gru_out @ params["wo"].T)[..., 0] + params["bo"][0, 0]
    out = jax.nn.sigmoid(dense_out + context) * mask + 1e-6
    return out, h_last[None], theta


def init_params(key, vocab_size, embed_size, hidden_size, n_topics):
    """Deterministic synthetic parameters.  Layout: (in_features, out_features)."""
    V, E, H, T = vocab_size, embed_size, hidden_size, n_topics
    ks = jax.random.split(key, 16)
    s = 0.1

    def rnd(k, shape):
        return jax.random.normal(k, shape, dtype=jnp.float32) * s

    return {
        "we":  rnd(ks[0], (V, E)),            # embed (no bias)
        "wih": rnd(ks[1], (E, 3 * H)),        # GRU input weights (r|z|n)
        "bih": rnd(ks[2], (1, 3 * H)),
        "whh": rnd(ks[3], (H, 3 * H)),        # GRU hidden weights (r|z|n)
        "bhh": rnd(ks[4], (1, 3 * H)),
        "w1":  rnd(ks[5], (V, H)),            # dense1
        "b1":  rnd(ks[6], (1, H)),
        "w2":  rnd(ks[7], (H, H)),            # dense2
        "b2":  rnd(ks[8], (1, H)),
        "wmu": rnd(ks[9], (H, T)),            # mu
        "bmu": rnd(ks[10], (1, T)),
        "wls": rnd(ks[11], (H, T)),           # log_sigma
        "bls": rnd(ks[12], (1, T)),
        "wb":  rnd(ks[13], (V, T)),           # B (no bias)
        "wo":  rnd(ks[14], (1, H)),           # output_dense weight (row vector)
        "bo":  rnd(ks[15], (1, 1)),           # output_dense bias
    }


if __name__ == "__main__":
    # Small shapes consistent with ContentModel(vocab, embed, hidden, topics, max_len)
    batch, seq_len = 2, 8
    vocab_size, embed_size, hidden_size, n_topics = 32, 16, 32, 8

    root = jax.random.PRNGKey(0)
    k_par, k_x, k_mask, k_eps = jax.random.split(root, 4)

    params = init_params(k_par, vocab_size, embed_size, hidden_size, n_topics)
    x = jax.random.normal(k_x, (batch, seq_len, vocab_size), dtype=jnp.float32)
    mask = (jax.random.uniform(k_mask, (batch, seq_len)) > 0.3).astype(jnp.float32)
    # torch.randn_like(mu) equivalent: pre-sampled standard normal noise.
    eps = jax.random.normal(k_eps, (batch, n_topics), dtype=jnp.float32)

    out, h_n, theta = content_model_forward(params, x, mask, eps)
    jax.block_until_ready((out, h_n, theta))

    assert out.shape == (batch, seq_len)
    assert h_n.shape == (1, batch, hidden_size)
    assert theta.shape == (batch, n_topics)
    assert bool(jnp.all(jnp.isfinite(out)))
    assert bool(jnp.all(jnp.isfinite(h_n)))
    assert bool(jnp.all(jnp.abs(jnp.sum(theta, axis=-1) - 1.0) < 1e-4))

    # Tolerance check against the pure-JAX f32 reference (bf16 matmuls in the kernel).
    out_r, h_n_r, theta_r = content_model_reference(params, x, mask, eps)
    assert bool(jnp.max(jnp.abs(out - out_r)) < 3e-2)
    assert bool(jnp.max(jnp.abs(h_n - h_n_r)) < 3e-2)
    assert bool(jnp.max(jnp.abs(theta - theta_r)) < 3e-2)

    print("KERNEL_OK")
</pallas_src>

<mosaic_0001>
module attributes {stable_mosaic.version = 11 : i64} {
  func.func @content_kernel(%arg0: i32, %arg1: memref<1x64x32xbf16, #tpu.memory_space<vmem>>, %arg2: memref<1x8x8xf32, #tpu.memory_space<vmem>>, %arg3: memref<1x8x8xf32, #tpu.memory_space<vmem>>, %arg4: memref<32x520xbf16, #tpu.memory_space<vmem>>, %arg5: memref<32x32xbf16, #tpu.memory_space<vmem>>, %arg6: memref<1x32xf32, #tpu.memory_space<vmem>>, %arg7: memref<1x32xf32, #tpu.memory_space<vmem>>, %arg8: memref<32x8xbf16, #tpu.memory_space<vmem>>, %arg9: memref<1x8xf32, #tpu.memory_space<vmem>>, %arg10: memref<32x8xbf16, #tpu.memory_space<vmem>>, %arg11: memref<1x8xf32, #tpu.memory_space<vmem>>, %arg12: memref<32x384xbf16, #tpu.memory_space<vmem>>, %arg13: memref<1x32xf32, #tpu.memory_space<vmem>>, %arg14: memref<1x32xf32, #tpu.memory_space<vmem>>, %arg15: memref<1x32xf32, #tpu.memory_space<vmem>>, %arg16: memref<1x32xf32, #tpu.memory_space<vmem>>, %arg17: memref<1x32xf32, #tpu.memory_space<vmem>>, %arg18: memref<1x1xf32, #tpu.memory_space<vmem>>, %arg19: memref<1x8x8xf32, #tpu.memory_space<vmem>>, %arg20: memref<1x8x32xf32, #tpu.memory_space<vmem>>, %arg21: memref<1x8x8xf32, #tpu.memory_space<vmem>>, %arg22: memref<8x8x32xbf16, #tpu.memory_space<vmem>>, %arg23: memref<8x8x32xbf16, #tpu.memory_space<vmem>>, %arg24: memref<8x8x32xbf16, #tpu.memory_space<vmem>>, %arg25: memref<8x8x32xbf16, #tpu.memory_space<vmem>>) attributes {dimension_semantics = [#tpu.dimension_semantics<parallel>], iteration_bounds = array<i64: 1>, scalar_prefetch = 0 : i64, scratch_operands = 4 : i64, tpu.core_type = #tpu.core_type<tc>, window_params = [{transform_indices = @transform_0, window_bounds = array<i64: 1, 64, 32>}, {transform_indices = @transform_1, window_bounds = array<i64: 1, 8, 8>}, {transform_indices = @transform_2, window_bounds = array<i64: 1, 8, 8>}, {pipeline_mode = #tpu.pipeline_mode<synchronous>, transform_indices = @transform_3, window_bounds = array<i64: 32, 520>}, {pipeline_mode = #tpu.pipeline_mode<synchronous>, transform_indices = @transform_4, window_bounds = array<i64: 32, 32>}, {pipeline_mode = #tpu.pipeline_mode<synchronous>, transform_indices = @transform_5, window_bounds = array<i64: 1, 32>}, {pipeline_mode = #tpu.pipeline_mode<synchronous>, transform_indices = @transform_6, window_bounds = array<i64: 1, 32>}, {pipeline_mode = #tpu.pipeline_mode<synchronous>, transform_indices = @transform_7, window_bounds = array<i64: 32, 8>}, {pipeline_mode = #tpu.pipeline_mode<synchronous>, transform_indices = @transform_8, window_bounds = array<i64: 1, 8>}, {pipeline_mode = #tpu.pipeline_mode<synchronous>, transform_indices = @transform_9, window_bounds = array<i64: 32, 8>}, {pipeline_mode = #tpu.pipeline_mode<synchronous>, transform_indices = @transform_10, window_bounds = array<i64: 1, 8>}, {pipeline_mode = #tpu.pipeline_mode<synchronous>, transform_indices = @transform_11, window_bounds = array<i64: 32, 384>}, {pipeline_mode = #tpu.pipeline_mode<synchronous>, transform_indices = @transform_12, window_bounds = array<i64: 1, 32>}, {pipeline_mode = #tpu.pipeline_mode<synchronous>, transform_indices = @transform_13, window_bounds = array<i64: 1, 32>}, {pipeline_mode = #tpu.pipeline_mode<synchronous>, transform_indices = @transform_14, window_bounds = array<i64: 1, 32>}, {pipeline_mode = #tpu.pipeline_mode<synchronous>, transform_indices = @transform_15, window_bounds = array<i64: 1, 32>}, {pipeline_mode = #tpu.pipeline_mode<synchronous>, transform_indices = @transform_16, window_bounds = array<i64: 1, 32>}, {pipeline_mode = #tpu.pipeline_mode<synchronous>, transform_indices = @transform_17, window_bounds = array<i64: 1, 1>}, {transform_indices = @transform_18, window_bounds = array<i64: 1, 8, 8>}, {transform_indices = @transform_19, window_bounds = array<i64: 1, 8, 32>}, {transform_indices = @transform_20, window_bounds = array<i64: 1, 8, 8>}]} {
    %c0 = arith.constant 0 : index
    %c0_0 = arith.constant 0 : index
    %c0_1 = arith.constant 0 : index
    %0 = vector.load %arg1[%c0, %c0_0, %c0_1] : memref<1x64x32xbf16, #tpu.memory_space<vmem>>, vector<1x64x32xbf16>
    %1 = vector.shape_cast %0 : vector<1x64x32xbf16> to vector<64x32xbf16>
    %c0_2 = arith.constant 0 : index
    %c0_3 = arith.constant 0 : index
    %c0_4 = arith.constant 0 : index
    %2 = vector.load %arg2[%c0_2, %c0_3, %c0_4] : memref<1x8x8xf32, #tpu.memory_space<vmem>>, vector<1x8x8xf32>
    %3 = vector.shape_cast %2 : vector<1x8x8xf32> to vector<8x8xf32>
    %c0_5 = arith.constant 0 : index
    %c0_6 = arith.constant 0 : index
    %c0_7 = arith.constant 0 : index
    %4 = vector.load %arg3[%c0_5, %c0_6, %c0_7] : memref<1x8x8xf32, #tpu.memory_space<vmem>>, vector<1x8x8xf32>
    %5 = vector.shape_cast %4 : vector<1x8x8xf32> to vector<8x8xf32>
    %c0_8 = arith.constant 0 : index
    %c0_9 = arith.constant 0 : index
    %6 = vector.load %arg4[%c0_8, %c0_9] : memref<32x520xbf16, #tpu.memory_space<vmem>>, vector<32x520xbf16>
    %cst = arith.constant dense<0.000000e+00> : vector<64x520xf32>
    %7 = tpu.matmul %1, %6, %cst {dimension_numbers = #tpu.dot_dimension_numbers<[1], [0], [0], [1], [0, 0, 1, 1], [], []>} : vector<64x32xbf16>, vector<32x520xbf16>, vector<64x520xf32> -> vector<64x520xf32>
    %8 = vector.extract_strided_slice %7 {offsets = [0, 0], sizes = [64, 32], strides = [1, 1]} : vector<64x520xf32> to vector<64x32xf32>
    %c0_10 = arith.constant 0 : index
    %c0_11 = arith.constant 0 : index
    %9 = vector.load %arg6[%c0_10, %c0_11] : memref<1x32xf32, #tpu.memory_space<vmem>>, vector<1x32xf32>
    %10 = vector.broadcast %9 : vector<1x32xf32> to vector<64x32xf32>
    %11 = arith.addf %8, %10 : vector<64x32xf32>
    %cst_12 = arith.constant 0.000000e+00 : f32
    %12 = vector.broadcast %cst_12 : f32 to vector<64x32xf32>
    %13 = arith.maximumf %11, %12 : vector<64x32xf32>
    %14 = arith.truncf %13 : vector<64x32xf32> to vector<64x32xbf16>
    %c0_13 = arith.constant 0 : index
    %c0_14 = arith.constant 0 : index
    %15 = vector.load %arg5[%c0_13, %c0_14] : memref<32x32xbf16, #tpu.memory_space<vmem>>, vector<32x32xbf16>
    %cst_15 = arith.constant dense<0.000000e+00> : vector<64x32xf32>
    %16 = tpu.matmul %14, %15, %cst_15 {dimension_numbers = #tpu.dot_dimension_numbers<[1], [0], [0], [1], [0, 0, 1, 1], [], []>} : vector<64x32xbf16>, vector<32x32xbf16>, vector<64x32xf32> -> vector<64x32xf32>
    %c0_16 = arith.constant 0 : index
    %c0_17 = arith.constant 0 : index
    %17 = vector.load %arg7[%c0_16, %c0_17] : memref<1x32xf32, #tpu.memory_space<vmem>>, vector<1x32xf32>
    %18 = vector.broadcast %17 : vector<1x32xf32> to vector<64x32xf32>
    %19 = arith.addf %16, %18 : vector<64x32xf32>
    %cst_18 = arith.constant 0.000000e+00 : f32
    %20 = vector.broadcast %cst_18 : f32 to vector<64x32xf32>
    %21 = arith.maximumf %19, %20 : vector<64x32xf32>
    %22 = vector.shape_cast %21 : vector<64x32xf32> to vector<8x8x32xf32>
    %cst_19 = arith.constant dense<0.000000e+00> : vector<8x32xf32>
    %23 = vector.multi_reduction <add>, %22, %cst_19 [0] : vector<8x8x32xf32> to vector<8x32xf32>
    %cst_20 = arith.constant 8.000000e+00 : f32
    %24 = vector.broadcast %cst_20 : f32 to vector<8x32xf32>
    %25 = arith.divf %23, %24 : vector<8x32xf32>
    %26 = arith.truncf %25 : vector<8x32xf32> to vector<8x32xbf16>
    %c0_21 = arith.constant 0 : index
    %c0_22 = arith.constant 0 : index
    %27 = vector.load %arg8[%c0_21, %c0_22] : memref<32x8xbf16, #tpu.memory_space<vmem>>, vector<32x8xbf16>
    %cst_23 = arith.constant dense<0.000000e+00> : vector<8x8xf32>
    %28 = tpu.matmul %26, %27, %cst_23 {dimension_numbers = #tpu.dot_dimension_numbers<[1], [0], [0], [1], [0, 0, 1, 1], [], []>} : vector<8x32xbf16>, vector<32x8xbf16>, vector<8x8xf32> -> vector<8x8xf32>
    %c0_24 = arith.constant 0 : index
    %c0_25 = arith.constant 0 : index
    %29 = vector.load %arg9[%c0_24, %c0_25] : memref<1x8xf32, #tpu.memory_space<vmem>>, vector<1x8xf32>
    %30 = vector.broadcast %29 : vector<1x8xf32> to vector<8x8xf32>
    %31 = arith.addf %28, %30 : vector<8x8xf32>
    %c0_26 = arith.constant 0 : index
    %c0_27 = arith.constant 0 : index
    %32 = vector.load %arg10[%c0_26, %c0_27] : memref<32x8xbf16, #tpu.memory_space<vmem>>, vector<32x8xbf16>
    %cst_28 = arith.constant dense<0.000000e+00> : vector<8x8xf32>
    %33 = tpu.matmul %26, %32, %cst_28 {dimension_numbers = #tpu.dot_dimension_numbers<[1], [0], [0], [1], [0, 0, 1, 1], [], []>} : vector<8x32xbf16>, vector<32x8xbf16>, vector<8x8xf32> -> vector<8x8xf32>
    %c0_29 = arith.constant 0 : index
    %c0_30 = arith.constant 0 : index
    %34 = vector.load %arg11[%c0_29, %c0_30] : memref<1x8xf32, #tpu.memory_space<vmem>>, vector<1x8xf32>
    %35 = vector.broadcast %34 : vector<1x8xf32> to vector<8x8xf32>
    %36 = arith.addf %33, %35 : vector<8x8xf32>
    %cst_31 = arith.constant 5.000000e-01 : f32
    %37 = vector.broadcast %cst_31 : f32 to vector<8x8xf32>
    %38 = arith.mulf %37, %36 : vector<8x8xf32>
    %39 = math.exp %38 : vector<8x8xf32>
    %40 = arith.mulf %39, %5 : vector<8x8xf32>
    %41 = arith.addf %31, %40 : vector<8x8xf32>
    %cst_32 = arith.constant dense<0xFF800000> : vector<8xf32>
    %42 = vector.multi_reduction <maximumf>, %41, %cst_32 [1] : vector<8x8xf32> to vector<8xf32>
    %43 = vector.shape_cast %42 : vector<8xf32> to vector<8x1xf32>
    %44 = vector.broadcast %43 : vector<8x1xf32> to vector<8x8xf32>
    %45 = arith.subf %41, %44 : vector<8x8xf32>
    %46 = math.exp %45 : vector<8x8xf32>
    %cst_33 = arith.constant dense<0.000000e+00> : vector<8xf32>
    %47 = vector.multi_reduction <add>, %46, %cst_33 [1] : vector<8x8xf32> to vector<8xf32>
    %48 = vector.shape_cast %47 : vector<8xf32> to vector<8x1xf32>
    %49 = vector.broadcast %48 : vector<8x1xf32> to vector<8x8xf32>
    %50 = arith.divf %46, %49 : vector<8x8xf32>
    %c0_34 = arith.constant 0 : index
    %c0_35 = arith.constant 0 : index
    %c0_36 = arith.constant 0 : index
    %51 = vector.load %arg21[%c0_34, %c0_35, %c0_36] : memref<1x8x8xf32, #tpu.memory_space<vmem>>, vector<1x8x8xf32>
    %52 = vector.shape_cast %51 : vector<1x8x8xf32> to vector<8x8xf32>
    %53 = vector.shape_cast %50 : vector<8x8xf32> to vector<1x8x8xf32>
    tpu.vector_store %arg21[%c0_34, %c0_35, %c0_36], %53 {strides = array<i32>} : memref<1x8x8xf32, #tpu.memory_space<vmem>>, vector<1x8x8xf32>,
    %54 = vector.extract_strided_slice %7 {offsets = [0, 512], sizes = [64, 8], strides = [1, 1]} : vector<64x520xf32> to vector<64x8xf32>
    %55 = vector.shape_cast %54 : vector<64x8xf32> to vector<8x8x8xf32>
    %56 = vector.shape_cast %50 : vector<8x8xf32> to vector<1x8x8xf32>
    %57 = vector.broadcast %56 : vector<1x8x8xf32> to vector<8x8x8xf32>
    %58 = arith.mulf %55, %57 : vector<8x8x8xf32>
    %cst_37 = arith.constant dense<0.000000e+00> : vector<8x8xf32>
    %59 = vector.multi_reduction <add>, %58, %cst_37 [2] : vector<8x8x8xf32> to vector<8x8xf32>
    %cst_38 = arith.constant 8.000000e+00 : f32
    %60 = vector.broadcast %cst_38 : f32 to vector<8x8xf32>
    %61 = arith.divf %59, %60 : vector<8x8xf32>
    %62 = vector.shape_cast %7 : vector<64x520xf32> to vector<8x8x520xf32>
    %63 = vector.shape_cast %3 : vector<8x8xf32> to vector<8x8x1xf32>
    %64 = vector.extract_strided_slice %62 {offsets = [0, 0, 128], sizes = [8, 8, 32], strides = [1, 1, 1]} : vector<8x8x520xf32> to vector<8x8x32xf32>
    %65 = vector.broadcast %63 : vector<8x8x1xf32> to vector<8x8x32xf32>
    %66 = arith.mulf %64, %65 : vector<8x8x32xf32>
    %c0_39 = arith.constant 0 : index
    %c0_40 = arith.constant 0 : index
    %67 = vector.load %arg13[%c0_39, %c0_40] : memref<1x32xf32, #tpu.memory_space<vmem>>, vector<1x32xf32>
    %68 = vector.shape_cast %67 : vector<1x32xf32> to vector<1x1x32xf32>
    %69 = vector.broadcast %68 : vector<1x1x32xf32> to vector<8x8x32xf32>
    %70 = arith.addf %66, %69 : vector<8x8x32xf32>
    %71 = arith.truncf %70 : vector<8x8x32xf32> to vector<8x8x32xbf16>
    %c0_41 = arith.constant 0 : index
    %c0_42 = arith.constant 0 : index
    %c0_43 = arith.constant 0 : index
    %72 = vector.load %arg22[%c0_41, %c0_42, %c0_43] : memref<8x8x32xbf16, #tpu.memory_space<vmem>>, vector<8x8x32xbf16>
    tpu.vector_store %arg22[%c0_41, %c0_42, %c0_43], %71 {strides = array<i32>} : memref<8x8x32xbf16, #tpu.memory_space<vmem>>, vector<8x8x32xbf16>,
    %73 = vector.extract_strided_slice %62 {offsets = [0, 0, 256], sizes = [8, 8, 32], strides = [1, 1, 1]} : vector<8x8x520xf32> to vector<8x8x32xf32>
    %74 = vector.broadcast %63 : vector<8x8x1xf32> to vector<8x8x32xf32>
    %75 = arith.mulf %73, %74 : vector<8x8x32xf32>
    %c0_44 = arith.constant 0 : index
    %c0_45 = arith.constant 0 : index
    %76 = vector.load %arg14[%c0_44, %c0_45] : memref<1x32xf32, #tpu.memory_space<vmem>>, vector<1x32xf32>
    %77 = vector.shape_cast %76 : vector<1x32xf32> to vector<1x1x32xf32>
    %78 = vector.broadcast %77 : vector<1x1x32xf32> to vector<8x8x32xf32>
    %79 = arith.addf %75, %78 : vector<8x8x32xf32>
    %80 = arith.truncf %79 : vector<8x8x32xf32> to vector<8x8x32xbf16>
    %c0_46 = arith.constant 0 : index
    %c0_47 = arith.constant 0 : index
    %c0_48 = arith.constant 0 : index
    %81 = vector.load %arg23[%c0_46, %c0_47, %c0_48] : memref<8x8x32xbf16, #tpu.memory_space<vmem>>, vector<8x8x32xbf16>
    tpu.vector_store %arg23[%c0_46, %c0_47, %c0_48], %80 {strides = array<i32>} : memref<8x8x32xbf16, #tpu.memory_space<vmem>>, vector<8x8x32xbf16>,
    %82 = vector.extract_strided_slice %62 {offsets = [0, 0, 384], sizes = [8, 8, 32], strides = [1, 1, 1]} : vector<8x8x520xf32> to vector<8x8x32xf32>
    %83 = vector.broadcast %63 : vector<8x8x1xf32> to vector<8x8x32xf32>
    %84 = arith.mulf %82, %83 : vector<8x8x32xf32>
    %c0_49 = arith.constant 0 : index
    %c0_50 = arith.constant 0 : index
    %85 = vector.load %arg15[%c0_49, %c0_50] : memref<1x32xf32, #tpu.memory_space<vmem>>, vector<1x32xf32>
    %86 = vector.shape_cast %85 : vector<1x32xf32> to vector<1x1x32xf32>
    %87 = vector.broadcast %86 : vector<1x1x32xf32> to vector<8x8x32xf32>
    %88 = arith.addf %84, %87 : vector<8x8x32xf32>
    %89 = arith.truncf %88 : vector<8x8x32xf32> to vector<8x8x32xbf16>
    %c0_51 = arith.constant 0 : index
    %c0_52 = arith.constant 0 : index
    %c0_53 = arith.constant 0 : index
    %90 = vector.load %arg24[%c0_51, %c0_52, %c0_53] : memref<8x8x32xbf16, #tpu.memory_space<vmem>>, vector<8x8x32xbf16>
    tpu.vector_store %arg24[%c0_51, %c0_52, %c0_53], %89 {strides = array<i32>} : memref<8x8x32xbf16, #tpu.memory_space<vmem>>, vector<8x8x32xbf16>,
    %c0_54 = arith.constant 0 : index
    %c0_55 = arith.constant 0 : index
    %91 = vector.load %arg16[%c0_54, %c0_55] : memref<1x32xf32, #tpu.memory_space<vmem>>, vector<1x32xf32>
    %cst_56 = arith.constant 0.000000e+00 : f32
    %92 = vector.broadcast %cst_56 : f32 to vector<8x32xf32>
    %c0_i32 = arith.constant 0 : i32
    %93 = arith.truncf %92 : vector<8x32xf32> to vector<8x32xbf16>
    %c0_57 = arith.constant 0 : index
    %c0_58 = arith.constant 0 : index
    %94 = vector.load %arg12[%c0_57, %c0_58] : memref<32x384xbf16, #tpu.memory_space<vmem>>, vector<32x384xbf16>
    %cst_59 = arith.constant dense<0.000000e+00> : vector<8x384xf32>
    %95 = tpu.matmul %93, %94, %cst_59 {dimension_numbers = #tpu.dot_dimension_numbers<[1], [0], [0], [1], [0, 0, 1, 1], [], []>} : vector<8x32xbf16>, vector<32x384xbf16>, vector<8x384xf32> -> vector<8x384xf32>
    %96 = arith.index_cast %c0_i32 : i32 to index
    %c0_60 = arith.constant 0 : index
    %c0_61 = arith.constant 0 : index
    %97 = vector.load %arg22[%96, %c0_60, %c0_61] : memref<8x8x32xbf16, #tpu.memory_space<vmem>>, vector<1x8x32xbf16>
    %98 = vector.shape_cast %97 : vector<1x8x32xbf16> to vector<8x32xbf16>
    %99 = arith.extf %98 : vector<8x32xbf16> to vector<8x32xf32>
    %100 = vector.extract_strided_slice %95 {offsets = [0, 0], sizes = [8, 32], strides = [1, 1]} : vector<8x384xf32> to vector<8x32xf32>
    %101 = arith.addf %99, %100 : vector<8x32xf32>
    %102 = arith.negf %101 : vector<8x32xf32>
    %103 = math.exp %102 : vector<8x32xf32>
    %cst_62 = arith.constant 1.000000e+00 : f32
    %104 = vector.broadcast %cst_62 : f32 to vector<8x32xf32>
    %105 = arith.addf %104, %103 : vector<8x32xf32>
    %106 = arith.divf %104, %105 : vector<8x32xf32>
    %107 = arith.index_cast %c0_i32 : i32 to index
    %c0_63 = arith.constant 0 : index
    %c0_64 = arith.constant 0 : index
    %108 = vector.load %arg23[%107, %c0_63, %c0_64] : memref<8x8x32xbf16, #tpu.memory_space<vmem>>, vector<1x8x32xbf16>
    %109 = vector.shape_cast %108 : vector<1x8x32xbf16> to vector<8x32xbf16>
    %110 = arith.extf %109 : vector<8x32xbf16> to vector<8x32xf32>
    %111 = vector.extract_strided_slice %95 {offsets = [0, 128], sizes = [8, 32], strides = [1, 1]} : vector<8x384xf32> to vector<8x32xf32>
    %112 = arith.addf %110, %111 : vector<8x32xf32>
    %113 = arith.negf %112 : vector<8x32xf32>
    %114 = math.exp %113 : vector<8x32xf32>
    %cst_65 = arith.constant 1.000000e+00 : f32
    %115 = vector.broadcast %cst_65 : f32 to vector<8x32xf32>
    %116 = arith.addf %115, %114 : vector<8x32xf32>
    %117 = arith.divf %115, %116 : vector<8x32xf32>
    %118 = arith.index_cast %c0_i32 : i32 to index
    %c0_66 = arith.constant 0 : index
    %c0_67 = arith.constant 0 : index
    %119 = vector.load %arg24[%118, %c0_66, %c0_67] : memref<8x8x32xbf16, #tpu.memory_space<vmem>>, vector<1x8x32xbf16>
    %120 = vector.shape_cast %119 : vector<1x8x32xbf16> to vector<8x32xbf16>
    %121 = arith.extf %120 : vector<8x32xbf16> to vector<8x32xf32>
    %122 = vector.extract_strided_slice %95 {offsets = [0, 256], sizes = [8, 32], strides = [1, 1]} : vector<8x384xf32> to vector<8x32xf32>
    %123 = vector.broadcast %91 : vector<1x32xf32> to vector<8x32xf32>
    %124 = arith.addf %122, %123 : vector<8x32xf32>
    %125 = arith.mulf %106, %124 : vector<8x32xf32>
    %126 = arith.addf %121, %125 : vector<8x32xf32>
    %127 = math.tanh %126 : vector<8x32xf32>
    %cst_68 = arith.constant 1.000000e+00 : f32
    %128 = vector.broadcast %cst_68 : f32 to vector<8x32xf32>
    %129 = arith.subf %128, %117 : vector<8x32xf32>
    %130 = arith.mulf %129, %127 : vector<8x32xf32>
    %131 = arith.mulf %117, %92 : vector<8x32xf32>
    %132 = arith.addf %130, %131 : vector<8x32xf32>
    %133 = arith.truncf %132 : vector<8x32xf32> to vector<8x32xbf16>
    %134 = arith.index_cast %c0_i32 : i32 to index
    %c0_69 = arith.constant 0 : index
    %c0_70 = arith.constant 0 : index
    %135 = vector.load %arg25[%134, %c0_69, %c0_70] : memref<8x8x32xbf16, #tpu.memory_space<vmem>>, vector<1x8x32xbf16>
    %136 = vector.shape_cast %135 : vector<1x8x32xbf16> to vector<8x32xbf16>
    %137 = vector.shape_cast %133 : vector<8x32xbf16> to vector<1x8x32xbf16>
    tpu.vector_store %arg25[%134, %c0_69, %c0_70], %137 {strides = array<i32>} : memref<8x8x32xbf16, #tpu.memory_space<vmem>>, vector<1x8x32xbf16>,
    %c1_i32 = arith.constant 1 : i32
    %138 = arith.truncf %132 : vector<8x32xf32> to vector<8x32xbf16>
    %c0_71 = arith.constant 0 : index
    %c0_72 = arith.constant 0 : index
    %139 = vector.load %arg12[%c0_71, %c0_72] : memref<32x384xbf16, #tpu.memory_space<vmem>>, vector<32x384xbf16>
    %cst_73 = arith.constant dense<0.000000e+00> : vector<8x384xf32>
    %140 = tpu.matmul %138, %139, %cst_73 {dimension_numbers = #tpu.dot_dimension_numbers<[1], [0], [0], [1], [0, 0, 1, 1], [], []>} : vector<8x32xbf16>, vector<32x384xbf16>, vector<8x384xf32> -> vector<8x384xf32>
    %141 = arith.index_cast %c1_i32 : i32 to index
    %c0_74 = arith.constant 0 : index
    %c0_75 = arith.constant 0 : index
    %142 = vector.load %arg22[%141, %c0_74, %c0_75] : memref<8x8x32xbf16, #tpu.memory_space<vmem>>, vector<1x8x32xbf16>
    %143 = vector.shape_cast %142 : vector<1x8x32xbf16> to vector<8x32xbf16>
    %144 = arith.extf %143 : vector<8x32xbf16> to vector<8x32xf32>
    %145 = vector.extract_strided_slice %140 {offsets = [0, 0], sizes = [8, 32], strides = [1, 1]} : vector<8x384xf32> to vector<8x32xf32>
    %146 = arith.addf %144, %145 : vector<8x32xf32>
    %147 = arith.negf %146 : vector<8x32xf32>
    %148 = math.exp %147 : vector<8x32xf32>
    %cst_76 = arith.constant 1.000000e+00 : f32
    %149 = vector.broadcast %cst_76 : f32 to vector<8x32xf32>
    %150 = arith.addf %149, %148 : vector<8x32xf32>
    %151 = arith.divf %149, %150 : vector<8x32xf32>
    %152 = arith.index_cast %c1_i32 : i32 to index
    %c0_77 = arith.constant 0 : index
    %c0_78 = arith.constant 0 : index
    %153 = vector.load %arg23[%152, %c0_77, %c0_78] : memref<8x8x32xbf16, #tpu.memory_space<vmem>>, vector<1x8x32xbf16>
    %154 = vector.shape_cast %153 : vector<1x8x32xbf16> to vector<8x32xbf16>
    %155 = arith.extf %154 : vector<8x32xbf16> to vector<8x32xf32>
    %156 = vector.extract_strided_slice %140 {offsets = [0, 128], sizes = [8, 32], strides = [1, 1]} : vector<8x384xf32> to vector<8x32xf32>
    %157 = arith.addf %155, %156 : vector<8x32xf32>
    %158 = arith.negf %157 : vector<8x32xf32>
    %159 = math.exp %158 : vector<8x32xf32>
    %cst_79 = arith.constant 1.000000e+00 : f32
    %160 = vector.broadcast %cst_79 : f32 to vector<8x32xf32>
    %161 = arith.addf %160, %159 : vector<8x32xf32>
    %162 = arith.divf %160, %161 : vector<8x32xf32>
    %163 = arith.index_cast %c1_i32 : i32 to index
    %c0_80 = arith.constant 0 : index
    %c0_81 = arith.constant 0 : index
    %164 = vector.load %arg24[%163, %c0_80, %c0_81] : memref<8x8x32xbf16, #tpu.memory_space<vmem>>, vector<1x8x32xbf16>
    %165 = vector.shape_cast %164 : vector<1x8x32xbf16> to vector<8x32xbf16>
    %166 = arith.extf %165 : vector<8x32xbf16> to vector<8x32xf32>
    %167 = vector.extract_strided_slice %140 {offsets = [0, 256], sizes = [8, 32], strides = [1, 1]} : vector<8x384xf32> to vector<8x32xf32>
    %168 = vector.broadcast %91 : vector<1x32xf32> to vector<8x32xf32>
    %169 = arith.addf %167, %168 : vector<8x32xf32>
    %170 = arith.mulf %151, %169 : vector<8x32xf32>
    %171 = arith.addf %166, %170 : vector<8x32xf32>
    %172 = math.tanh %171 : vector<8x32xf32>
    %cst_82 = arith.constant 1.000000e+00 : f32
    %173 = vector.broadcast %cst_82 : f32 to vector<8x32xf32>
    %174 = arith.subf %173, %162 : vector<8x32xf32>
    %175 = arith.mulf %174, %172 : vector<8x32xf32>
    %176 = arith.mulf %162, %132 : vector<8x32xf32>
    %177 = arith.addf %175, %176 : vector<8x32xf32>
    %178 = arith.truncf %177 : vector<8x32xf32> to vector<8x32xbf16>
    %179 = arith.index_cast %c1_i32 : i32 to index
    %c0_83 = arith.constant 0 : index
    %c0_84 = arith.constant 0 : index
    %180 = vector.load %arg25[%179, %c0_83, %c0_84] : memref<8x8x32xbf16, #tpu.memory_space<vmem>>, vector<1x8x32xbf16>
    %181 = vector.shape_cast %180 : vector<1x8x32xbf16> to vector<8x32xbf16>
    %182 = vector.shape_cast %178 : vector<8x32xbf16> to vector<1x8x32xbf16>
    tpu.vector_store %arg25[%179, %c0_83, %c0_84], %182 {strides = array<i32>} : memref<8x8x32xbf16, #tpu.memory_space<vmem>>, vector<1x8x32xbf16>,
    %c2_i32 = arith.constant 2 : i32
    %183 = arith.truncf %177 : vector<8x32xf32> to vector<8x32xbf16>
    %c0_85 = arith.constant 0 : index
    %c0_86 = arith.constant 0 : index
    %184 = vector.load %arg12[%c0_85, %c0_86] : memref<32x384xbf16, #tpu.memory_space<vmem>>, vector<32x384xbf16>
    %cst_87 = arith.constant dense<0.000000e+00> : vector<8x384xf32>
    %185 = tpu.matmul %183, %184, %cst_87 {dimension_numbers = #tpu.dot_dimension_numbers<[1], [0], [0], [1], [0, 0, 1, 1], [], []>} : vector<8x32xbf16>, vector<32x384xbf16>, vector<8x384xf32> -> vector<8x384xf32>
    %186 = arith.index_cast %c2_i32 : i32 to index
    %c0_88 = arith.constant 0 : index
    %c0_89 = arith.constant 0 : index
    %187 = vector.load %arg22[%186, %c0_88, %c0_89] : memref<8x8x32xbf16, #tpu.memory_space<vmem>>, vector<1x8x32xbf16>
    %188 = vector.shape_cast %187 : vector<1x8x32xbf16> to vector<8x32xbf16>
    %189 = arith.extf %188 : vector<8x32xbf16> to vector<8x32xf32>
    %190 = vector.extract_strided_slice %185 {offsets = [0, 0], sizes = [8, 32], strides = [1, 1]} : vector<8x384xf32> to vector<8x32xf32>
    %191 = arith.addf %189, %190 : vector<8x32xf32>
    %192 = arith.negf %191 : vector<8x32xf32>
    %193 = math.exp %192 : vector<8x32xf32>
    %cst_90 = arith.constant 1.000000e+00 : f32
    %194 = vector.broadcast %cst_90 : f32 to vector<8x32xf32>
    %195 = arith.addf %194, %193 : vector<8x32xf32>
    %196 = arith.divf %194, %195 : vector<8x32xf32>
    %197 = arith.index_cast %c2_i32 : i32 to index
    %c0_91 = arith.constant 0 : index
    %c0_92 = arith.constant 0 : index
    %198 = vector.load %arg23[%197, %c0_91, %c0_92] : memref<8x8x32xbf16, #tpu.memory_space<vmem>>, vector<1x8x32xbf16>
    %199 = vector.shape_cast %198 : vector<1x8x32xbf16> to vector<8x32xbf16>
    %200 = arith.extf %199 : vector<8x32xbf16> to vector<8x32xf32>
    %201 = vector.extract_strided_slice %185 {offsets = [0, 128], sizes = [8, 32], strides = [1, 1]} : vector<8x384xf32> to vector<8x32xf32>
    %202 = arith.addf %200, %201 : vector<8x32xf32>
    %203 = arith.negf %202 : vector<8x32xf32>
    %204 = math.exp %203 : vector<8x32xf32>
    %cst_93 = arith.constant 1.000000e+00 : f32
    %205 = vector.broadcast %cst_93 : f32 to vector<8x32xf32>
    %206 = arith.addf %205, %204 : vector<8x32xf32>
    %207 = arith.divf %205, %206 : vector<8x32xf32>
    %208 = arith.index_cast %c2_i32 : i32 to index
    %c0_94 = arith.constant 0 : index
    %c0_95 = arith.constant 0 : index
    %209 = vector.load %arg24[%208, %c0_94, %c0_95] : memref<8x8x32xbf16, #tpu.memory_space<vmem>>, vector<1x8x32xbf16>
    %210 = vector.shape_cast %209 : vector<1x8x32xbf16> to vector<8x32xbf16>
    %211 = arith.extf %210 : vector<8x32xbf16> to vector<8x32xf32>
    %212 = vector.extract_strided_slice %185 {offsets = [0, 256], sizes = [8, 32], strides = [1, 1]} : vector<8x384xf32> to vector<8x32xf32>
    %213 = vector.broadcast %91 : vector<1x32xf32> to vector<8x32xf32>
    %214 = arith.addf %212, %213 : vector<8x32xf32>
    %215 = arith.mulf %196, %214 : vector<8x32xf32>
    %216 = arith.addf %211, %215 : vector<8x32xf32>
    %217 = math.tanh %216 : vector<8x32xf32>
    %cst_96 = arith.constant 1.000000e+00 : f32
    %218 = vector.broadcast %cst_96 : f32 to vector<8x32xf32>
    %219 = arith.subf %218, %207 : vector<8x32xf32>
    %220 = arith.mulf %219, %217 : vector<8x32xf32>
    %221 = arith.mulf %207, %177 : vector<8x32xf32>
    %222 = arith.addf %220, %221 : vector<8x32xf32>
    %223 = arith.truncf %222 : vector<8x32xf32> to vector<8x32xbf16>
    %224 = arith.index_cast %c2_i32 : i32 to index
    %c0_97 = arith.constant 0 : index
    %c0_98 = arith.constant 0 : index
    %225 = vector.load %arg25[%224, %c0_97, %c0_98] : memref<8x8x32xbf16, #tpu.memory_space<vmem>>, vector<1x8x32xbf16>
    %226 = vector.shape_cast %225 : vector<1x8x32xbf16> to vector<8x32xbf16>
    %227 = vector.shape_cast %223 : vector<8x32xbf16> to vector<1x8x32xbf16>
    tpu.vector_store %arg25[%224, %c0_97, %c0_98], %227 {strides = array<i32>} : memref<8x8x32xbf16, #tpu.memory_space<vmem>>, vector<1x8x32xbf16>,
    %c3_i32 = arith.constant 3 : i32
    %228 = arith.truncf %222 : vector<8x32xf32> to vector<8x32xbf16>
    %c0_99 = arith.constant 0 : index
    %c0_100 = arith.constant 0 : index
    %229 = vector.load %arg12[%c0_99, %c0_100] : memref<32x384xbf16, #tpu.memory_space<vmem>>, vector<32x384xbf16>
    %cst_101 = arith.constant dense<0.000000e+00> : vector<8x384xf32>
    %230 = tpu.matmul %228, %229, %cst_101 {dimension_numbers = #tpu.dot_dimension_numbers<[1], [0], [0], [1], [0, 0, 1, 1], [], []>} : vector<8x32xbf16>, vector<32x384xbf16>, vector<8x384xf32> -> vector<8x384xf32>
    %231 = arith.index_cast %c3_i32 : i32 to index
    %c0_102 = arith.constant 0 : index
    %c0_103 = arith.constant 0 : index
    %232 = vector.load %arg22[%231, %c0_102, %c0_103] : memref<8x8x32xbf16, #tpu.memory_space<vmem>>, vector<1x8x32xbf16>
    %233 = vector.shape_cast %232 : vector<1x8x32xbf16> to vector<8x32xbf16>
    %234 = arith.extf %233 : vector<8x32xbf16> to vector<8x32xf32>
    %235 = vector.extract_strided_slice %230 {offsets = [0, 0], sizes = [8, 32], strides = [1, 1]} : vector<8x384xf32> to vector<8x32xf32>
    %236 = arith.addf %234, %235 : vector<8x32xf32>
    %237 = arith.negf %236 : vector<8x32xf32>
    %238 = math.exp %237 : vector<8x32xf32>
    %cst_104 = arith.constant 1.000000e+00 : f32
    %239 = vector.broadcast %cst_104 : f32 to vector<8x32xf32>
    %240 = arith.addf %239, %238 : vector<8x32xf32>
    %241 = arith.divf %239, %240 : vector<8x32xf32>
    %242 = arith.index_cast %c3_i32 : i32 to index
    %c0_105 = arith.constant 0 : index
    %c0_106 = arith.constant 0 : index
    %243 = vector.load %arg23[%242, %c0_105, %c0_106] : memref<8x8x32xbf16, #tpu.memory_space<vmem>>, vector<1x8x32xbf16>
    %244 = vector.shape_cast %243 : vector<1x8x32xbf16> to vector<8x32xbf16>
    %245 = arith.extf %244 : vector<8x32xbf16> to vector<8x32xf32>
    %246 = vector.extract_strided_slice %230 {offsets = [0, 128], sizes = [8, 32], strides = [1, 1]} : vector<8x384xf32> to vector<8x32xf32>
    %247 = arith.addf %245, %246 : vector<8x32xf32>
    %248 = arith.negf %247 : vector<8x32xf32>
    %249 = math.exp %248 : vector<8x32xf32>
    %cst_107 = arith.constant 1.000000e+00 : f32
    %250 = vector.broadcast %cst_107 : f32 to vector<8x32xf32>
    %251 = arith.addf %250, %249 : vector<8x32xf32>
    %252 = arith.divf %250, %251 : vector<8x32xf32>
    %253 = arith.index_cast %c3_i32 : i32 to index
    %c0_108 = arith.constant 0 : index
    %c0_109 = arith.constant 0 : index
    %254 = vector.load %arg24[%253, %c0_108, %c0_109] : memref<8x8x32xbf16, #tpu.memory_space<vmem>>, vector<1x8x32xbf16>
    %255 = vector.shape_cast %254 : vector<1x8x32xbf16> to vector<8x32xbf16>
    %256 = arith.extf %255 : vector<8x32xbf16> to vector<8x32xf32>
    %257 = vector.extract_strided_slice %230 {offsets = [0, 256], sizes = [8, 32], strides = [1, 1]} : vector<8x384xf32> to vector<8x32xf32>
    %258 = vector.broadcast %91 : vector<1x32xf32> to vector<8x32xf32>
    %259 = arith.addf %257, %258 : vector<8x32xf32>
    %260 = arith.mulf %241, %259 : vector<8x32xf32>
    %261 = arith.addf %256, %260 : vector<8x32xf32>
    %262 = math.tanh %261 : vector<8x32xf32>
    %cst_110 = arith.constant 1.000000e+00 : f32
    %263 = vector.broadcast %cst_110 : f32 to vector<8x32xf32>
    %264 = arith.subf %263, %252 : vector<8x32xf32>
    %265 = arith.mulf %264, %262 : vector<8x32xf32>
    %266 = arith.mulf %252, %222 : vector<8x32xf32>
    %267 = arith.addf %265, %266 : vector<8x32xf32>
    %268 = arith.truncf %267 : vector<8x32xf32> to vector<8x32xbf16>
    %269 = arith.index_cast %c3_i32 : i32 to index
    %c0_111 = arith.constant 0 : index
    %c0_112 = arith.constant 0 : index
    %270 = vector.load %arg25[%269, %c0_111, %c0_112] : memref<8x8x32xbf16, #tpu.memory_space<vmem>>, vector<1x8x32xbf16>
    %271 = vector.shape_cast %270 : vector<1x8x32xbf16> to vector<8x32xbf16>
    %272 = vector.shape_cast %268 : vector<8x32xbf16> to vector<1x8x32xbf16>
    tpu.vector_store %arg25[%269, %c0_111, %c0_112], %272 {strides = array<i32>} : memref<8x8x32xbf16, #tpu.memory_space<vmem>>, vector<1x8x32xbf16>,
    %c4_i32 = arith.constant 4 : i32
    %273 = arith.truncf %267 : vector<8x32xf32> to vector<8x32xbf16>
    %c0_113 = arith.constant 0 : index
    %c0_114 = arith.constant 0 : index
    %274 = vector.load %arg12[%c0_113, %c0_114] : memref<32x384xbf16, #tpu.memory_space<vmem>>, vector<32x384xbf16>
    %cst_115 = arith.constant dense<0.000000e+00> : vector<8x384xf32>
    %275 = tpu.matmul %273, %274, %cst_115 {dimension_numbers = #tpu.dot_dimension_numbers<[1], [0], [0], [1], [0, 0, 1, 1], [], []>} : vector<8x32xbf16>, vector<32x384xbf16>, vector<8x384xf32> -> vector<8x384xf32>
    %276 = arith.index_cast %c4_i32 : i32 to index
    %c0_116 = arith.constant 0 : index
    %c0_117 = arith.constant 0 : index
    %277 = vector.load %arg22[%276, %c0_116, %c0_117] : memref<8x8x32xbf16, #tpu.memory_space<vmem>>, vector<1x8x32xbf16>
    %278 = vector.shape_cast %277 : vector<1x8x32xbf16> to vector<8x32xbf16>
    %279 = arith.extf %278 : vector<8x32xbf16> to vector<8x32xf32>
    %280 = vector.extract_strided_slice %275 {offsets = [0, 0], sizes = [8, 32], strides = [1, 1]} : vector<8x384xf32> to vector<8x32xf32>
    %281 = arith.addf %279, %280 : vector<8x32xf32>
    %282 = arith.negf %281 : vector<8x32xf32>
    %283 = math.exp %282 : vector<8x32xf32>
    %cst_118 = arith.constant 1.000000e+00 : f32
    %284 = vector.broadcast %cst_118 : f32 to vector<8x32xf32>
    %285 = arith.addf %284, %283 : vector<8x32xf32>
    %286 = arith.divf %284, %285 : vector<8x32xf32>
    %287 = arith.index_cast %c4_i32 : i32 to index
    %c0_119 = arith.constant 0 : index
    %c0_120 = arith.constant 0 : index
    %288 = vector.load %arg23[%287, %c0_119, %c0_120] : memref<8x8x32xbf16, #tpu.memory_space<vmem>>, vector<1x8x32xbf16>
    %289 = vector.shape_cast %288 : vector<1x8x32xbf16> to vector<8x32xbf16>
    %290 = arith.extf %289 : vector<8x32xbf16> to vector<8x32xf32>
    %291 = vector.extract_strided_slice %275 {offsets = [0, 128], sizes = [8, 32], strides = [1, 1]} : vector<8x384xf32> to vector<8x32xf32>
    %292 = arith.addf %290, %291 : vector<8x32xf32>
    %293 = arith.negf %292 : vector<8x32xf32>
    %294 = math.exp %293 : vector<8x32xf32>
    %cst_121 = arith.constant 1.000000e+00 : f32
    %295 = vector.broadcast %cst_121 : f32 to vector<8x32xf32>
    %296 = arith.addf %295, %294 : vector<8x32xf32>
    %297 = arith.divf %295, %296 : vector<8x32xf32>
    %298 = arith.index_cast %c4_i32 : i32 to index
    %c0_122 = arith.constant 0 : index
    %c0_123 = arith.constant 0 : index
    %299 = vector.load %arg24[%298, %c0_122, %c0_123] : memref<8x8x32xbf16, #tpu.memory_space<vmem>>, vector<1x8x32xbf16>
    %300 = vector.shape_cast %299 : vector<1x8x32xbf16> to vector<8x32xbf16>
    %301 = arith.extf %300 : vector<8x32xbf16> to vector<8x32xf32>
    %302 = vector.extract_strided_slice %275 {offsets = [0, 256], sizes = [8, 32], strides = [1, 1]} : vector<8x384xf32> to vector<8x32xf32>
    %303 = vector.broadcast %91 : vector<1x32xf32> to vector<8x32xf32>
    %304 = arith.addf %302, %303 : vector<8x32xf32>
    %305 = arith.mulf %286, %304 : vector<8x32xf32>
    %306 = arith.addf %301, %305 : vector<8x32xf32>
    %307 = math.tanh %306 : vector<8x32xf32>
    %cst_124 = arith.constant 1.000000e+00 : f32
    %308 = vector.broadcast %cst_124 : f32 to vector<8x32xf32>
    %309 = arith.subf %308, %297 : vector<8x32xf32>
    %310 = arith.mulf %309, %307 : vector<8x32xf32>
    %311 = arith.mulf %297, %267 : vector<8x32xf32>
    %312 = arith.addf %310, %311 : vector<8x32xf32>
    %313 = arith.truncf %312 : vector<8x32xf32> to vector<8x32xbf16>
    %314 = arith.index_cast %c4_i32 : i32 to index
    %c0_125 = arith.constant 0 : index
    %c0_126 = arith.constant 0 : index
    %315 = vector.load %arg25[%314, %c0_125, %c0_126] : memref<8x8x32xbf16, #tpu.memory_space<vmem>>, vector<1x8x32xbf16>
    %316 = vector.shape_cast %315 : vector<1x8x32xbf16> to vector<8x32xbf16>
    %317 = vector.shape_cast %313 : vector<8x32xbf16> to vector<1x8x32xbf16>
    tpu.vector_store %arg25[%314, %c0_125, %c0_126], %317 {strides = array<i32>} : memref<8x8x32xbf16, #tpu.memory_space<vmem>>, vector<1x8x32xbf16>,
    %c5_i32 = arith.constant 5 : i32
    %318 = arith.truncf %312 : vector<8x32xf32> to vector<8x32xbf16>
    %c0_127 = arith.constant 0 : index
    %c0_128 = arith.constant 0 : index
    %319 = vector.load %arg12[%c0_127, %c0_128] : memref<32x384xbf16, #tpu.memory_space<vmem>>, vector<32x384xbf16>
    %cst_129 = arith.constant dense<0.000000e+00> : vector<8x384xf32>
    %320 = tpu.matmul %318, %319, %cst_129 {dimension_numbers = #tpu.dot_dimension_numbers<[1], [0], [0], [1], [0, 0, 1, 1], [], []>} : vector<8x32xbf16>, vector<32x384xbf16>, vector<8x384xf32> -> vector<8x384xf32>
    %321 = arith.index_cast %c5_i32 : i32 to index
    %c0_130 = arith.constant 0 : index
    %c0_131 = arith.constant 0 : index
    %322 = vector.load %arg22[%321, %c0_130, %c0_131] : memref<8x8x32xbf16, #tpu.memory_space<vmem>>, vector<1x8x32xbf16>
    %323 = vector.shape_cast %322 : vector<1x8x32xbf16> to vector<8x32xbf16>
    %324 = arith.extf %323 : vector<8x32xbf16> to vector<8x32xf32>
    %325 = vector.extract_strided_slice %320 {offsets = [0, 0], sizes = [8, 32], strides = [1, 1]} : vector<8x384xf32> to vector<8x32xf32>
    %326 = arith.addf %324, %325 : vector<8x32xf32>
    %327 = arith.negf %326 : vector<8x32xf32>
    %328 = math.exp %327 : vector<8x32xf32>
    %cst_132 = arith.constant 1.000000e+00 : f32
    %329 = vector.broadcast %cst_132 : f32 to vector<8x32xf32>
    %330 = arith.addf %329, %328 : vector<8x32xf32>
    %331 = arith.divf %329, %330 : vector<8x32xf32>
    %332 = arith.index_cast %c5_i32 : i32 to index
    %c0_133 = arith.constant 0 : index
    %c0_134 = arith.constant 0 : index
    %333 = vector.load %arg23[%332, %c0_133, %c0_134] : memref<8x8x32xbf16, #tpu.memory_space<vmem>>, vector<1x8x32xbf16>
    %334 = vector.shape_cast %333 : vector<1x8x32xbf16> to vector<8x32xbf16>
    %335 = arith.extf %334 : vector<8x32xbf16> to vector<8x32xf32>
    %336 = vector.extract_strided_slice %320 {offsets = [0, 128], sizes = [8, 32], strides = [1, 1]} : vector<8x384xf32> to vector<8x32xf32>
    %337 = arith.addf %335, %336 : vector<8x32xf32>
    %338 = arith.negf %337 : vector<8x32xf32>
    %339 = math.exp %338 : vector<8x32xf32>
    %cst_135 = arith.constant 1.000000e+00 : f32
    %340 = vector.broadcast %cst_135 : f32 to vector<8x32xf32>
    %341 = arith.addf %340, %339 : vector<8x32xf32>
    %342 = arith.divf %340, %341 : vector<8x32xf32>
    %343 = arith.index_cast %c5_i32 : i32 to index
    %c0_136 = arith.constant 0 : index
    %c0_137 = arith.constant 0 : index
    %344 = vector.load %arg24[%343, %c0_136, %c0_137] : memref<8x8x32xbf16, #tpu.memory_space<vmem>>, vector<1x8x32xbf16>
    %345 = vector.shape_cast %344 : vector<1x8x32xbf16> to vector<8x32xbf16>
    %346 = arith.extf %345 : vector<8x32xbf16> to vector<8x32xf32>
    %347 = vector.extract_strided_slice %320 {offsets = [0, 256], sizes = [8, 32], strides = [1, 1]} : vector<8x384xf32> to vector<8x32xf32>
    %348 = vector.broadcast %91 : vector<1x32xf32> to vector<8x32xf32>
    %349 = arith.addf %347, %348 : vector<8x32xf32>
    %350 = arith.mulf %331, %349 : vector<8x32xf32>
    %351 = arith.addf %346, %350 : vector<8x32xf32>
    %352 = math.tanh %351 : vector<8x32xf32>
    %cst_138 = arith.constant 1.000000e+00 : f32
    %353 = vector.broadcast %cst_138 : f32 to vector<8x32xf32>
    %354 = arith.subf %353, %342 : vector<8x32xf32>
    %355 = arith.mulf %354, %352 : vector<8x32xf32>
    %356 = arith.mulf %342, %312 : vector<8x32xf32>
    %357 = arith.addf %355, %356 : vector<8x32xf32>
    %358 = arith.truncf %357 : vector<8x32xf32> to vector<8x32xbf16>
    %359 = arith.index_cast %c5_i32 : i32 to index
    %c0_139 = arith.constant 0 : index
    %c0_140 = arith.constant 0 : index
    %360 = vector.load %arg25[%359, %c0_139, %c0_140] : memref<8x8x32xbf16, #tpu.memory_space<vmem>>, vector<1x8x32xbf16>
    %361 = vector.shape_cast %360 : vector<1x8x32xbf16> to vector<8x32xbf16>
    %362 = vector.shape_cast %358 : vector<8x32xbf16> to vector<1x8x32xbf16>
    tpu.vector_store %arg25[%359, %c0_139, %c0_140], %362 {strides = array<i32>} : memref<8x8x32xbf16, #tpu.memory_space<vmem>>, vector<1x8x32xbf16>,
    %c6_i32 = arith.constant 6 : i32
    %363 = arith.truncf %357 : vector<8x32xf32> to vector<8x32xbf16>
    %c0_141 = arith.constant 0 : index
    %c0_142 = arith.constant 0 : index
    %364 = vector.load %arg12[%c0_141, %c0_142] : memref<32x384xbf16, #tpu.memory_space<vmem>>, vector<32x384xbf16>
    %cst_143 = arith.constant dense<0.000000e+00> : vector<8x384xf32>
    %365 = tpu.matmul %363, %364, %cst_143 {dimension_numbers = #tpu.dot_dimension_numbers<[1], [0], [0], [1], [0, 0, 1, 1], [], []>} : vector<8x32xbf16>, vector<32x384xbf16>, vector<8x384xf32> -> vector<8x384xf32>
    %366 = arith.index_cast %c6_i32 : i32 to index
    %c0_144 = arith.constant 0 : index
    %c0_145 = arith.constant 0 : index
    %367 = vector.load %arg22[%366, %c0_144, %c0_145] : memref<8x8x32xbf16, #tpu.memory_space<vmem>>, vector<1x8x32xbf16>
    %368 = vector.shape_cast %367 : vector<1x8x32xbf16> to vector<8x32xbf16>
    %369 = arith.extf %368 : vector<8x32xbf16> to vector<8x32xf32>
    %370 = vector.extract_strided_slice %365 {offsets = [0, 0], sizes = [8, 32], strides = [1, 1]} : vector<8x384xf32> to vector<8x32xf32>
    %371 = arith.addf %369, %370 : vector<8x32xf32>
    %372 = arith.negf %371 : vector<8x32xf32>
    %373 = math.exp %372 : vector<8x32xf32>
    %cst_146 = arith.constant 1.000000e+00 : f32
    %374 = vector.broadcast %cst_146 : f32 to vector<8x32xf32>
    %375 = arith.addf %374, %373 : vector<8x32xf32>
    %376 = arith.divf %374, %375 : vector<8x32xf32>
    %377 = arith.index_cast %c6_i32 : i32 to index
    %c0_147 = arith.constant 0 : index
    %c0_148 = arith.constant 0 : index
    %378 = vector.load %arg23[%377, %c0_147, %c0_148] : memref<8x8x32xbf16, #tpu.memory_space<vmem>>, vector<1x8x32xbf16>
    %379 = vector.shape_cast %378 : vector<1x8x32xbf16> to vector<8x32xbf16>
    %380 = arith.extf %379 : vector<8x32xbf16> to vector<8x32xf32>
    %381 = vector.extract_strided_slice %365 {offsets = [0, 128], sizes = [8, 32], strides = [1, 1]} : vector<8x384xf32> to vector<8x32xf32>
    %382 = arith.addf %380, %381 : vector<8x32xf32>
    %383 = arith.negf %382 : vector<8x32xf32>
    %384 = math.exp %383 : vector<8x32xf32>
    %cst_149 = arith.constant 1.000000e+00 : f32
    %385 = vector.broadcast %cst_149 : f32 to vector<8x32xf32>
    %386 = arith.addf %385, %384 : vector<8x32xf32>
    %387 = arith.divf %385, %386 : vector<8x32xf32>
    %388 = arith.index_cast %c6_i32 : i32 to index
    %c0_150 = arith.constant 0 : index
    %c0_151 = arith.constant 0 : index
    %389 = vector.load %arg24[%388, %c0_150, %c0_151] : memref<8x8x32xbf16, #tpu.memory_space<vmem>>, vector<1x8x32xbf16>
    %390 = vector.shape_cast %389 : vector<1x8x32xbf16> to vector<8x32xbf16>
    %391 = arith.extf %390 : vector<8x32xbf16> to vector<8x32xf32>
    %392 = vector.extract_strided_slice %365 {offsets = [0, 256], sizes = [8, 32], strides = [1, 1]} : vector<8x384xf32> to vector<8x32xf32>
    %393 = vector.broadcast %91 : vector<1x32xf32> to vector<8x32xf32>
    %394 = arith.addf %392, %393 : vector<8x32xf32>
    %395 = arith.mulf %376, %394 : vector<8x32xf32>
    %396 = arith.addf %391, %395 : vector<8x32xf32>
    %397 = math.tanh %396 : vector<8x32xf32>
    %cst_152 = arith.constant 1.000000e+00 : f32
    %398 = vector.broadcast %cst_152 : f32 to vector<8x32xf32>
    %399 = arith.subf %398, %387 : vector<8x32xf32>
    %400 = arith.mulf %399, %397 : vector<8x32xf32>
    %401 = arith.mulf %387, %357 : vector<8x32xf32>
    %402 = arith.addf %400, %401 : vector<8x32xf32>
    %403 = arith.truncf %402 : vector<8x32xf32> to vector<8x32xbf16>
    %404 = arith.index_cast %c6_i32 : i32 to index
    %c0_153 = arith.constant 0 : index
    %c0_154 = arith.constant 0 : index
    %405 = vector.load %arg25[%404, %c0_153, %c0_154] : memref<8x8x32xbf16, #tpu.memory_space<vmem>>, vector<1x8x32xbf16>
    %406 = vector.shape_cast %405 : vector<1x8x32xbf16> to vector<8x32xbf16>
    %407 = vector.shape_cast %403 : vector<8x32xbf16> to vector<1x8x32xbf16>
    tpu.vector_store %arg25[%404, %c0_153, %c0_154], %407 {strides = array<i32>} : memref<8x8x32xbf16, #tpu.memory_space<vmem>>, vector<1x8x32xbf16>,
    %c7_i32 = arith.constant 7 : i32
    %408 = arith.truncf %402 : vector<8x32xf32> to vector<8x32xbf16>
    %c0_155 = arith.constant 0 : index
    %c0_156 = arith.constant 0 : index
    %409 = vector.load %arg12[%c0_155, %c0_156] : memref<32x384xbf16, #tpu.memory_space<vmem>>, vector<32x384xbf16>
    %cst_157 = arith.constant dense<0.000000e+00> : vector<8x384xf32>
    %410 = tpu.matmul %408, %409, %cst_157 {dimension_numbers = #tpu.dot_dimension_numbers<[1], [0], [0], [1], [0, 0, 1, 1], [], []>} : vector<8x32xbf16>, vector<32x384xbf16>, vector<8x384xf32> -> vector<8x384xf32>
    %411 = arith.index_cast %c7_i32 : i32 to index
    %c0_158 = arith.constant 0 : index
    %c0_159 = arith.constant 0 : index
    %412 = vector.load %arg22[%411, %c0_158, %c0_159] : memref<8x8x32xbf16, #tpu.memory_space<vmem>>, vector<1x8x32xbf16>
    %413 = vector.shape_cast %412 : vector<1x8x32xbf16> to vector<8x32xbf16>
    %414 = arith.extf %413 : vector<8x32xbf16> to vector<8x32xf32>
    %415 = vector.extract_strided_slice %410 {offsets = [0, 0], sizes = [8, 32], strides = [1, 1]} : vector<8x384xf32> to vector<8x32xf32>
    %416 = arith.addf %414, %415 : vector<8x32xf32>
    %417 = arith.negf %416 : vector<8x32xf32>
    %418 = math.exp %417 : vector<8x32xf32>
    %cst_160 = arith.constant 1.000000e+00 : f32
    %419 = vector.broadcast %cst_160 : f32 to vector<8x32xf32>
    %420 = arith.addf %419, %418 : vector<8x32xf32>
    %421 = arith.divf %419, %420 : vector<8x32xf32>
    %422 = arith.index_cast %c7_i32 : i32 to index
    %c0_161 = arith.constant 0 : index
    %c0_162 = arith.constant 0 : index
    %423 = vector.load %arg23[%422, %c0_161, %c0_162] : memref<8x8x32xbf16, #tpu.memory_space<vmem>>, vector<1x8x32xbf16>
    %424 = vector.shape_cast %423 : vector<1x8x32xbf16> to vector<8x32xbf16>
    %425 = arith.extf %424 : vector<8x32xbf16> to vector<8x32xf32>
    %426 = vector.extract_strided_slice %410 {offsets = [0, 128], sizes = [8, 32], strides = [1, 1]} : vector<8x384xf32> to vector<8x32xf32>
    %427 = arith.addf %425, %426 : vector<8x32xf32>
    %428 = arith.negf %427 : vector<8x32xf32>
    %429 = math.exp %428 : vector<8x32xf32>
    %cst_163 = arith.constant 1.000000e+00 : f32
    %430 = vector.broadcast %cst_163 : f32 to vector<8x32xf32>
    %431 = arith.addf %430, %429 : vector<8x32xf32>
    %432 = arith.divf %430, %431 : vector<8x32xf32>
    %433 = arith.index_cast %c7_i32 : i32 to index
    %c0_164 = arith.constant 0 : index
    %c0_165 = arith.constant 0 : index
    %434 = vector.load %arg24[%433, %c0_164, %c0_165] : memref<8x8x32xbf16, #tpu.memory_space<vmem>>, vector<1x8x32xbf16>
    %435 = vector.shape_cast %434 : vector<1x8x32xbf16> to vector<8x32xbf16>
    %436 = arith.extf %435 : vector<8x32xbf16> to vector<8x32xf32>
    %437 = vector.extract_strided_slice %410 {offsets = [0, 256], sizes = [8, 32], strides = [1, 1]} : vector<8x384xf32> to vector<8x32xf32>
    %438 = vector.broadcast %91 : vector<1x32xf32> to vector<8x32xf32>
    %439 = arith.addf %437, %438 : vector<8x32xf32>
    %440 = arith.mulf %421, %439 : vector<8x32xf32>
    %441 = arith.addf %436, %440 : vector<8x32xf32>
    %442 = math.tanh %441 : vector<8x32xf32>
    %cst_166 = arith.constant 1.000000e+00 : f32
    %443 = vector.broadcast %cst_166 : f32 to vector<8x32xf32>
    %444 = arith.subf %443, %432 : vector<8x32xf32>
    %445 = arith.mulf %444, %442 : vector<8x32xf32>
    %446 = arith.mulf %432, %402 : vector<8x32xf32>
    %447 = arith.addf %445, %446 : vector<8x32xf32>
    %448 = arith.truncf %447 : vector<8x32xf32> to vector<8x32xbf16>
    %449 = arith.index_cast %c7_i32 : i32 to index
    %c0_167 = arith.constant 0 : index
    %c0_168 = arith.constant 0 : index
    %450 = vector.load %arg25[%449, %c0_167, %c0_168] : memref<8x8x32xbf16, #tpu.memory_space<vmem>>, vector<1x8x32xbf16>
    %451 = vector.shape_cast %450 : vector<1x8x32xbf16> to vector<8x32xbf16>
    %452 = vector.shape_cast %448 : vector<8x32xbf16> to vector<1x8x32xbf16>
    tpu.vector_store %arg25[%449, %c0_167, %c0_168], %452 {strides = array<i32>} : memref<8x8x32xbf16, #tpu.memory_space<vmem>>, vector<1x8x32xbf16>,
    %c8_i32 = arith.constant 8 : i32
    %c0_169 = arith.constant 0 : index
    %c0_170 = arith.constant 0 : index
    %c0_171 = arith.constant 0 : index
    %453 = vector.load %arg20[%c0_169, %c0_170, %c0_171] : memref<1x8x32xf32, #tpu.memory_space<vmem>>, vector<1x8x32xf32>
    %454 = vector.shape_cast %453 : vector<1x8x32xf32> to vector<8x32xf32>
    %455 = vector.shape_cast %447 : vector<8x32xf32> to vector<1x8x32xf32>
    tpu.vector_store %arg20[%c0_169, %c0_170, %c0_171], %455 {strides = array<i32>} : memref<1x8x32xf32, #tpu.memory_space<vmem>>, vector<1x8x32xf32>,
    %c0_172 = arith.constant 0 : index
    %c0_173 = arith.constant 0 : index
    %c0_174 = arith.constant 0 : index
    %456 = vector.load %arg25[%c0_172, %c0_173, %c0_174] : memref<8x8x32xbf16, #tpu.memory_space<vmem>>, vector<8x8x32xbf16>
    %457 = arith.extf %456 : vector<8x8x32xbf16> to vector<8x8x32xf32>
    %c0_175 = arith.constant 0 : index
    %c0_176 = arith.constant 0 : index
    %458 = vector.load %arg17[%c0_175, %c0_176] : memref<1x32xf32, #tpu.memory_space<vmem>>, vector<1x32xf32>
    %459 = vector.shape_cast %458 : vector<1x32xf32> to vector<1x1x32xf32>
    %460 = vector.broadcast %459 : vector<1x1x32xf32> to vector<8x8x32xf32>
    %461 = arith.mulf %457, %460 : vector<8x8x32xf32>
    %cst_177 = arith.constant dense<0.000000e+00> : vector<8x8xf32>
    %462 = vector.multi_reduction <add>, %461, %cst_177 [2] : vector<8x8x32xf32> to vector<8x8xf32>
    %c0_178 = arith.constant 0 : index
    %c0_179 = arith.constant 0 : index
    %463 = vector.load %arg18[%c0_178, %c0_179] : memref<1x1xf32, #tpu.memory_space<vmem>>, vector<1x1xf32>
    %464 = vector.broadcast %463 : vector<1x1xf32> to vector<8x8xf32>
    %465 = arith.addf %462, %464 : vector<8x8xf32>
    %466 = arith.addf %465, %61 : vector<8x8xf32>
    %467 = arith.negf %466 : vector<8x8xf32>
    %468 = math.exp %467 : vector<8x8xf32>
    %cst_180 = arith.constant 1.000000e+00 : f32
    %469 = vector.broadcast %cst_180 : f32 to vector<8x8xf32>
    %470 = arith.addf %469, %468 : vector<8x8xf32>
    %471 = arith.divf %469, %470 : vector<8x8xf32>
    %472 = arith.mulf %471, %3 : vector<8x8xf32>
    %cst_181 = arith.constant 9.99999997E-7 : f32
    %473 = vector.broadcast %cst_181 : f32 to vector<8x8xf32>
    %474 = arith.addf %472, %473 : vector<8x8xf32>
    %c0_182 = arith.constant 0 : index
    %c0_183 = arith.constant 0 : index
    %c0_184 = arith.constant 0 : index
    %475 = vector.load %arg19[%c0_182, %c0_183, %c0_184] : memref<1x8x8xf32, #tpu.memory_space<vmem>>, vector<1x8x8xf32>
    %476 = vector.shape_cast %475 : vector<1x8x8xf32> to vector<8x8xf32>
    %477 = vector.shape_cast %474 : vector<8x8xf32> to vector<1x8x8xf32>
    tpu.vector_store %arg19[%c0_182, %c0_183, %c0_184], %477 {strides = array<i32>} : memref<1x8x8xf32, #tpu.memory_space<vmem>>, vector<1x8x8xf32>,
    return
  }
  func.func @transform_0(%arg0: i32) -> (i32, i32, i32) {
    %c0_i32 = arith.constant 0 : i32
    %c0_i32_0 = arith.constant 0 : i32
    %c0_i32_1 = arith.constant 0 : i32
    return %arg0, %c0_i32, %c0_i32_0 : i32, i32, i32
  }
  func.func @transform_1(%arg0: i32) -> (i32, i32, i32) {
    %c0_i32 = arith.constant 0 : i32
    %c0_i32_0 = arith.constant 0 : i32
    %c0_i32_1 = arith.constant 0 : i32
    return %arg0, %c0_i32, %c0_i32_0 : i32, i32, i32
  }
  func.func @transform_2(%arg0: i32) -> (i32, i32, i32) {
    %c0_i32 = arith.constant 0 : i32
    %c0_i32_0 = arith.constant 0 : i32
    %c0_i32_1 = arith.constant 0 : i32
    return %arg0, %c0_i32, %c0_i32_0 : i32, i32, i32
  }
  func.func @transform_3(%arg0: i32) -> (i32, i32) {
    %c0_i32 = arith.constant 0 : i32
    %c0_i32_0 = arith.constant 0 : i32
    %c0_i32_1 = arith.constant 0 : i32
    return %c0_i32, %c0_i32_0 : i32, i32
  }
  func.func @transform_4(%arg0: i32) -> (i32, i32) {
    %c0_i32 = arith.constant 0 : i32
    %c0_i32_0 = arith.constant 0 : i32
    %c0_i32_1 = arith.constant 0 : i32
    return %c0_i32, %c0_i32_0 : i32, i32
  }
  func.func @transform_5(%arg0: i32) -> (i32, i32) {
    %c0_i32 = arith.constant 0 : i32
    %c0_i32_0 = arith.constant 0 : i32
    %c0_i32_1 = arith.constant 0 : i32
    return %c0_i32, %c0_i32_0 : i32, i32
  }
  func.func @transform_6(%arg0: i32) -> (i32, i32) {
    %c0_i32 = arith.constant 0 : i32
    %c0_i32_0 = arith.constant 0 : i32
    %c0_i32_1 = arith.constant 0 : i32
    return %c0_i32, %c0_i32_0 : i32, i32
  }
  func.func @transform_7(%arg0: i32) -> (i32, i32) {
    %c0_i32 = arith.constant 0 : i32
    %c0_i32_0 = arith.constant 0 : i32
    %c0_i32_1 = arith.constant 0 : i32
    return %c0_i32, %c0_i32_0 : i32, i32
  }
  func.func @transform_8(%arg0: i32) -> (i32, i32) {
    %c0_i32 = arith.constant 0 : i32
    %c0_i32_0 = arith.constant 0 : i32
    %c0_i32_1 = arith.constant 0 : i32
    return %c0_i32, %c0_i32_0 : i32, i32
  }
  func.func @transform_9(%arg0: i32) -> (i32, i32) {
    %c0_i32 = arith.constant 0 : i32
    %c0_i32_0 = arith.constant 0 : i32
    %c0_i32_1 = arith.constant 0 : i32
    return %c0_i32, %c0_i32_0 : i32, i32
  }
  func.func @transform_10(%arg0: i32) -> (i32, i32) {
    %c0_i32 = arith.constant 0 : i32
    %c0_i32_0 = arith.constant 0 : i32
    %c0_i32_1 = arith.constant 0 : i32
    return %c0_i32, %c0_i32_0 : i32, i32
  }
  func.func @transform_11(%arg0: i32) -> (i32, i32) {
    %c0_i32 = arith.constant 0 : i32
    %c0_i32_0 = arith.constant 0 : i32
    %c0_i32_1 = arith.constant 0 : i32
    return %c0_i32, %c0_i32_0 : i32, i32
  }
  func.func @transform_12(%arg0: i32) -> (i32, i32) {
    %c0_i32 = arith.constant 0 : i32
    %c0_i32_0 = arith.constant 0 : i32
    %c0_i32_1 = arith.constant 0 : i32
    return %c0_i32, %c0_i32_0 : i32, i32
  }
  func.func @transform_13(%arg0: i32) -> (i32, i32) {
    %c0_i32 = arith.constant 0 : i32
    %c0_i32_0 = arith.constant 0 : i32
    %c0_i32_1 = arith.constant 0 : i32
    return %c0_i32, %c0_i32_0 : i32, i32
  }
  func.func @transform_14(%arg0: i32) -> (i32, i32) {
    %c0_i32 = arith.constant 0 : i32
    %c0_i32_0 = arith.constant 0 : i32
    %c0_i32_1 = arith.constant 0 : i32
    return %c0_i32, %c0_i32_0 : i32, i32
  }
  func.func @transform_15(%arg0: i32) -> (i32, i32) {
    %c0_i32 = arith.constant 0 : i32
    %c0_i32_0 = arith.constant 0 : i32
    %c0_i32_1 = arith.constant 0 : i32
    return %c0_i32, %c0_i32_0 : i32, i32
  }
  func.func @transform_16(%arg0: i32) -> (i32, i32) {
    %c0_i32 = arith.constant 0 : i32
    %c0_i32_0 = arith.constant 0 : i32
    %c0_i32_1 = arith.constant 0 : i32
    return %c0_i32, %c0_i32_0 : i32, i32
  }
  func.func @transform_17(%arg0: i32) -> (i32, i32) {
    %c0_i32 = arith.constant 0 : i32
    %c0_i32_0 = arith.constant 0 : i32
    %c0_i32_1 = arith.constant 0 : i32
    return %c0_i32, %c0_i32_0 : i32, i32
  }
  func.func @transform_18(%arg0: i32) -> (i32, i32, i32) {
    %c0_i32 = arith.constant 0 : i32
    %c0_i32_0 = arith.constant 0 : i32
    %c0_i32_1 = arith.constant 0 : i32
    return %arg0, %c0_i32, %c0_i32_0 : i32, i32, i32
  }
  func.func @transform_19(%arg0: i32) -> (i32, i32, i32) {
    %c0_i32 = arith.constant 0 : i32
    %c0_i32_0 = arith.constant 0 : i32
    %c0_i32_1 = arith.constant 0 : i32
    return %arg0, %c0_i32, %c0_i32_0 : i32, i32, i32
  }
  func.func @transform_20(%arg0: i32) -> (i32, i32, i32) {
    %c0_i32 = arith.constant 0 : i32
    %c0_i32_0 = arith.constant 0 : i32
    %c0_i32_1 = arith.constant 0 : i32
    return %arg0, %c0_i32, %c0_i32_0 : i32, i32, i32
  }
}

</mosaic_0001>

<bundles_post_ra>
// kernel: content_model_forward.1
= control target key start
LH: loop header
LB: loop body
LE: loop exit
PB: predicated region body
PF: predicated region fallthrough
CT: control target
= control target key end

     0   :  { %v723_v0 = vlaneseq  ;;  %v2943_v2 = vmov 0   ;;  %vm159_vm0 = vcmask 261120   ;;  %vm810_vm1 = vcmask 257024   ;;  %s3649_s3 = inlined_call_operand.vmem [shape: bf16[32,520], index: 3, kind: input, shape index: {}]   ;;  %s3650_s0 = inlined_call_operand.vmem [shape: bf16[1,64,32], index: 0, kind: input, shape index: {}]   ;;  %s3651_s1 = inlined_call_operand.vmem [shape: f32[1,8,8], index: 1, kind: input, shape index: {}]   ;;  %s3652_s4 = inlined_call_operand.vmem [shape: bf16[32,32], index: 4, kind: input, shape index: {}]   ;;  %s3653_s5 = inlined_call_operand.vmem [shape: f32[1,32], index: 5, kind: input, shape index: {}]   ;;  %s3654_s12 = inlined_call_operand.vmem [shape: f32[1,32], index: 12, kind: input, shape index: {}]   ;;  %s3655_s13 = inlined_call_operand.vmem [shape: f32[1,32], index: 13, kind: input, shape index: {}]   ;;  %s3656_s14 = inlined_call_operand.vmem [shape: f32[1,32], index: 14, kind: input, shape index: {}]   ;;  %s3657_s7 = inlined_call_operand.vmem [shape: bf16[32,8], index: 7, kind: input, shape index: {}]   ;;  %s3658_s9 = inlined_call_operand.vmem [shape: bf16[32,8], index: 9, kind: input, shape index: {}]   ;;  %s3659_s11 = inlined_call_operand.vmem [shape: bf16[32,384], index: 11, kind: input, shape index: {}]   ;;  %s3660_s6 = inlined_call_operand.vmem [shape: f32[1,32], index: 6, kind: input, shape index: {}]   ;;  %s3661_s10 = inlined_call_operand.vmem [shape: f32[1,8], index: 10, kind: input, shape index: {}]   ;;  %s3662_s8 = inlined_call_operand.vmem [shape: f32[1,8], index: 8, kind: input, shape index: {}]   ;;  %s3663_s2 = inlined_call_operand.vmem [shape: f32[1,8,8], index: 2, kind: input, shape index: {}]   ;;  %s3664_s15 = inlined_call_operand.vmem [shape: f32[1,32], index: 15, kind: input, shape index: {}]   ;;  %s3665_s17 = inlined_call_operand.<no memory space> [shape: f32[1,1], index: 17, kind: input, shape index: {}]   ;;  %s3666_s16 = inlined_call_operand.vmem [shape: f32[1,32], index: 16, kind: input, shape index: {}]   ;;  %s3667_s20 = inlined_call_operand.vmem [shape: f32[1,8,8], index: 20, kind: output, shape index: {2}]   ;;  %s3668_s19 = inlined_call_operand.vmem [shape: f32[1,8,32], index: 19, kind: output, shape index: {1}]   ;;  %s3669_s18 = inlined_call_operand.vmem [shape: f32[1,8,8], index: 18, kind: output, shape index: {0}]  }
   0x1   :  { %3673 = sst [smem:[#allocation7_spill]] %s3649_s3  ;;  %204 = vmatprep.mubr.bf16.mxu0 %v2943_v2  ;;  %277 = vmatprep.mubr.bf16.mxu1 %v2943_v2  ;;  %v3176_v41 = vld [vmem:[%s3654_s12] ss:$0 sm:$0xff]  ;;  %vm2945_vm2 = vmmov 0   ;;  %vm670_vm3 = vcmask 64512   ;;  %vm2441_vm4 = vcmask 1041409  }
   0x2   :  { %3674 = sst [smem:[#allocation8_spill]] %s3650_s0  ;;  %s3678_s23 = sld [smem:[#allocation7_spill]]  ;;  %v3060_v4 = vshrl.u32 %v723_v0, 7  ;;  %2771 = vset.pattern.permute.xlu1 %v2943_v2  ;;  %2772 = vset.pattern.permute.xlu0 %v2943_v2  ;;  %v3189_v59 = vld [vmem:[%s3655_s13] ss:$0 sm:$0xff]  ;;  %vm2443_vm5 = vcmask 1042434  }
   0x3   :  { %3675 = sst [smem:[#allocation9_spill]] %s3651_s1  ;;  %s3679_s29 = sld [smem:[#allocation8_spill]]  ;;  %vm2445_vm6 = vcmask 1043459   ;;  %vm2447_vm7 = vcmask 1044484   ;;  %vm2449_vm8 = vcmask 1045509   ;;  %vm2451_vm9 = vcmask 1046534  }
   0x4   :  { %3676 = sst [smem:[#allocation10_spill]] %s3652_s4  ;;  %v725_v7 = vsub.s32 0, %v3060_v4  ;;  %v732_v8 = vsub.s32 1, %v3060_v4  ;;  %v739_v9 = vsub.s32 2, %v3060_v4  ;;  %s3680_s21 = sld [smem:[#allocation9_spill]]  ;;  %v746_v12 = vsub.s32 3, %v3060_v4 }
   0x5   :  { %3677 = sst [smem:[#allocation11_spill]] %s3653_s5  ;;  %v753_v16 = vsub.s32 4, %v3060_v4  ;;  %v760_v17 = vsub.s32 5, %v3060_v4  ;;  %s3681_s30 = sld [smem:[#allocation10_spill]]  ;;  %v767_v26 = vsub.s32 6, %v3060_v4  ;;  %v774_v29 = vsub.s32 7, %v3060_v4 }
   0x6   :  { %s3682_s5 = sld [smem:[#allocation11_spill]]  ;;  %vm2453_vm10 = vcmask 1047559  }
   0x8   :  { %v2773_v1 = vld [vmem:[%s3678_s23 + $0x4] ss:$20 sps:$4 sm:$0xff]   ;;  %v2775_v3 = vld [vmem:[%s3678_s23] ss:$20 sps:$4 sm:$0xff]   ;;  %v2778_v6 = vld [vmem:[%s3678_s23 + $0x28] ss:$20 sps:$4 sm:$0xff]  }
   0x9   :  { %172 = vmatprep.subr.bf16.mxu0 %v2773_v1  ;;  %v2776_v5 = vld [vmem:[%s3678_s23 + $0x2c] ss:$20 sps:$4 sm:$0xff]   ;;  %v2785_v18 = vld [vmem:[%s3678_s23 + $0x8] ss:$20 sps:$4 sm:$0xff]   ;;  %v2788_v22 = vld [vmem:[%s3678_s23 + $0x30] ss:$20 sps:$4 sm:$0xff]  }
   0xa   :  { %173 = vmatpush1.bf16.msra.mxu0 %v2775_v3  ;;  %v2779_v10 = vld [vmem:[%s3679_s29] sm:$0xff]   ;;  %v2786_v21 = vld [vmem:[%s3678_s23 + $0x34] ss:$20 sps:$4 sm:$0xff]   ;;  %v3149_v32 = vld [vmem:[%s3679_s29 + $0x18] sm:$0xff]  }
   0xb   :  { %174 = vmatprep.subr.bf16.mxu0 %v2776_v5  ;;  %v73_v11 = vld [vmem:[%s3680_s21] sm:$0xff]  ;;  %v3119_v27 = vld [vmem:[%s3679_s29 + $0x8] sm:$0xff]   ;;  %v3137_v31 = vld [vmem:[%s3679_s29 + $0x10] sm:$0xff]  }
   0xc   :  { %v3080_v13 = vrot.slane %v73_v11, %v725_v7  ;;  %v3082_v14 = vrot.slane %v73_v11, %v739_v9  ;;  %v2783_v15 = vld [vmem:[%s3678_s23 + $0xc] ss:$20 sps:$4 sm:$0xff]   ;;  %v3093_v19 = vrot.slane %v73_v11, %v732_v8  ;;  %v3096_v20 = vrot.slane %v73_v11, %v746_v12  ;;  %v2791_v34 = vld [vmem:[%s3678_s23 + $0x10] ss:$20 sps:$4 sm:$0xff]  }
   0xd   :  { %245 = vmatprep.subr.bf16.mxu1 %v2783_v15  ;;  %v2789_v23 = vld [vmem:[%s3681_s30] sm:$0xff]   ;;  %v3111_v24 = vrot.slane %v73_v11, %v753_v16  ;;  %v3113_v25 = vrot.slane %v73_v11, %v760_v17  ;;  %v3123_v28 = vrot.slane %v73_v11, %v767_v26  ;;  %v3132_v30 = vrot.slane %v73_v11, %v774_v29  ;;  %v2790_v33 = vld [vmem:[%s3681_s30 + $0x8] sm:$0xff]  }
   0xe   :  { %175 = vmatpush1.bf16.msra.mxu0 %v2778_v6  ;;  %728 = vbcast.lane.b32.xlu0 %v3080_v13, 256  ;;  %v3168_v36 = vld [vmem:[%s3682_s5] ss:$0 sm:$0xff] }
   0xf   :  { %742 = vbcast.lane.b32.xlu1 %v3082_v14, 256  ;;  %246 = vmatpush1.bf16.msra.mxu1 %v2785_v18  ;;  %v3196_v1 = vld [vmem:[%s3656_s14] ss:$0 sm:$0xff] }
  0x10   :  { %247 = vmatprep.subr.bf16.mxu1 %v2786_v21  ;;  %2664 = vmatprep.subr.bf16.mxu0 %v2791_v34 }
  0x11   :  { %2483 = vmatmul.mubr.msk.bf16.vlgmr.msra.gmra.mrb[0].mxu0 %vm159_vm0, %v2779_v10 }
  0x12   :  { %214 = vmatprep.mubr.bf16.mxu0 %v2943_v2  ;;  %735 = vbcast.lane.b32.xlu0 %v3093_v19, 256 }
  0x13   :  { %749 = vbcast.lane.b32.xlu1 %v3096_v20, 256  ;;  %248 = vmatpush1.bf16.msra.mxu1 %v2788_v22 }
  0x14   :  { %2676 = vmatprep.subr.bf16.mxu1 %v2789_v23  ;;  %2665 = vmatpush3.bf16.msra.mxu0 %v2791_v34 }
  0x16   :  { %756 = vbcast.lane.b32.xlu0 %v3111_v24, 256  ;;  %2487 = vmatmul.mubr.msk.bf16.vlgmr.msra.gmra.mrb[0].mxu1 %vm159_vm0, %v2779_v10 }
  0x17   :  { %763 = vbcast.lane.b32.xlu1 %v3113_v25, 256  ;;  %287 = vmatprep.mubr.bf16.mxu1 %v2943_v2 }
  0x18   :  { %2677 = vmatpush3.bf16.msra.mxu1 %v2789_v23 }
  0x19   :  { %2484 = vmatmul.mubr.msk.bf16.gmra.mrb[4].mxu0 %vm159_vm0, %v3119_v27  ;;  %2678 = vmatprep.subr.bf16.mxu1 %v2790_v33 }
  0x1a   :  { %224 = vmatprep.mubr.bf16.mxu0 %v2943_v2  ;;  %770 = vbcast.lane.b32.xlu0 %v3123_v28, 256 }
  0x1c   :  { %2679 = vmatpush3.bf16.msra.mxu1 %v2790_v33 }
  0x1e   :  { %777 = vbcast.lane.b32.xlu0 %v3132_v30, 256  ;;  %2488 = vmatmul.mubr.msk.bf16.gmra.mrb[4].mxu1 %vm159_vm0, %v3119_v27 }
  0x1f   :  { %297 = vmatprep.mubr.bf16.mxu1 %v2943_v2 }
  0x21   :  { %2485 = vmatmul.mubr.msk.bf16.gmra.mrb[8].mxu0 %vm159_vm0, %v3137_v31 }
  0x22   :  { %234 = vmatprep.mubr.bf16.mxu0 %v2943_v2 }
  0x26   :  { %2489 = vmatmul.mubr.msk.bf16.gmra.mrb[8].mxu1 %vm159_vm0, %v3137_v31 }
  0x27   :  { %307 = vmatprep.mubr.bf16.mxu1 %v2943_v2 }
  0x29   :  { %2486 = vmatmul.mubr.msk.bf16.gmra.mrb[12].mxu0 %vm159_vm0, %v3149_v32 }
  0x2a   :  { %2668 = vmatprep.mubr.msk.bf16.mxu0 %vm159_vm0, %v2779_v10 }
  0x2e   :  { %2490 = vmatmul.mubr.msk.bf16.gmra.mrb[12].mxu1 %vm159_vm0, %v3149_v32 }
  0x80   :  { %v729_v35 = vpop.permute.xlu0 %728 }
  0x81   :  { %v3170_v38 = vpop.permute.xlu1 %742 }
  0x84   :  { %v736_v42 = vpop.permute.xlu0 %735 }
  0x85   :  { %v3181_v54 = vpop.permute.xlu1 %749 }
  0x88   :  { %v3183_v55 = vpop.permute.xlu0 %756 }
  0xe4   :  { %v206_v37 = vpop.f32.mrb[0].mxu0 }
  0xe5   :  { %v390_v39 = vadd.f32 %v3168_v36, %v206_v37  ;;  %v208_v40 = vpop.f32.mrb[1].mxu0 }
  0xe6   :  { %v779_v43 = vmul.f32 %v729_v35, %v208_v40  ;;  %v210_v44 = vpop.f32.mrb[2].mxu0  ;;  %v3210_v40 = vpop.permute.xlu0 %770 }
  0xe7   :  { %v391_v45 = vadd.f32 %v3168_v36, %v210_v44  ;;  %v212_v46 = vpop.f32.mrb[3].mxu0  ;;  %v398_v49 = vmax.f32 %v390_v39, 0.0  ;;  %v3208_v39 = vpop.permute.xlu1 %763 }
  0xe8   :  { %v794_v47 = vadd.f32 %v3176_v41, %v779_v43  ;;  %v780_v48 = vmul.f32 %v736_v42, %v212_v46 }
  0xe9   :  { %v399_v50 = vmax.f32 %v391_v45, 0.0  ;;  %v279_v58 = vpop.f32.mrb[0].mxu1 }
  0xea   :  { %v802_v51 = vpack.c.bf16 %v794_v47, %v794_v47  ;;  %v795_v52 = vadd.f32 %v3176_v41, %v780_v48  ;;  %v819_v62 = vmul.f32 %v729_v35, %v279_v58  ;;  %v281_v63 = vpop.f32.mrb[1].mxu1 }
  0xeb   :  { %v406_v53 = vpack.c.bf16 %v399_v50, %v398_v49  ;;  %v858_v6 = vmul.f32 %v729_v35, %v281_v63  ;;  %v283_v7 = vpop.f32.mrb[2].mxu1 }
  0xec   :  { %811 = vst.msk [vmem:[#allocation2] sm:$0xf] %vm810_vm1, %v802_v51  ;;  %v803_v56 = vpack.c.bf16 %v795_v52, %v795_v52  ;;  %v216_v57 = vpop.f32.mrb[4].mxu0  ;;  %v834_v10 = vadd.f32 %v3189_v59, %v819_v62  ;;  %v820_v11 = vmul.f32 %v736_v42, %v283_v7  ;;  %v285_v12 = vpop.f32.mrb[3].mxu1 }
  0xed   :  { %v392_v60 = vadd.f32 %v3168_v36, %v216_v57  ;;  %v218_v61 = vpop.f32.mrb[5].mxu0  ;;  %2680 = vmatprep.mubr.msk.bf16.mxu1 %vm159_vm0, %v406_v53  ;;  %v873_v17 = vadd.f32 %v3196_v1, %v858_v6  ;;  %v859_v18 = vmul.f32 %v736_v42, %v285_v12 }
  0xee   :  { %812 = vst.msk [vmem:[#allocation2 + $0x4] sm:$0xf] %vm810_vm1, %v803_v56  ;;  %v781_v3 = vmul.f32 %v3170_v38, %v218_v61  ;;  %v220_v5 = vpop.f32.mrb[6].mxu0  ;;  %v842_v23 = vpack.c.bf16 %v834_v10, %v834_v10  ;;  %v835_v26 = vadd.f32 %v3189_v59, %v820_v11 }
  0xef   :  { %v393_v8 = vadd.f32 %v3168_v36, %v220_v5  ;;  %v222_v9 = vpop.f32.mrb[7].mxu0  ;;  %v400_v21 = vmax.f32 %v392_v60, 0.0  ;;  %v881_v34 = vpack.c.bf16 %v873_v17, %v873_v17  ;;  %v874_v35 = vadd.f32 %v3196_v1, %v859_v18  ;;  %v778_v17 = vpop.permute.xlu0 %777 }
  0xf0   :  { %v796_v15 = vadd.f32 %v3176_v41, %v781_v3  ;;  %v782_v16 = vmul.f32 %v3181_v54, %v222_v9  ;;  %850 = vst.msk [vmem:[#allocation3] sm:$0xf] %vm810_vm1, %v842_v23  ;;  %v843_v43 = vpack.c.bf16 %v835_v26, %v835_v26 }
  0xf1   :  { %v401_v22 = vmax.f32 %v393_v8, 0.0  ;;  %889 = vst.msk [vmem:[#allocation4] sm:$0xf] %vm810_vm1, %v881_v34  ;;  %v882_v45 = vpack.c.bf16 %v874_v35, %v874_v35  ;;  %v289_v46 = vpop.f32.mrb[4].mxu1 }
  0xf2   :  { %v804_v29 = vpack.c.bf16 %v796_v15, %v796_v15  ;;  %v797_v33 = vadd.f32 %v3176_v41, %v782_v16  ;;  %851 = vst.msk [vmem:[#allocation3 + $0x4] sm:$0xf] %vm810_vm1, %v843_v43  ;;  %v821_v49 = vmul.f32 %v3170_v38, %v289_v46  ;;  %v291_v50 = vpop.f32.mrb[5].mxu1 }
  0xf3   :  { %v407_v37 = vpack.c.bf16 %v401_v22, %v400_v21  ;;  %890 = vst.msk [vmem:[#allocation4 + $0x4] sm:$0xf] %vm810_vm1, %v882_v45  ;;  %v860_v53 = vmul.f32 %v3170_v38, %v291_v50  ;;  %v293_v56 = vpop.f32.mrb[6].mxu1 }
  0xf4   :  { %813 = vst.msk [vmem:[#allocation2 + $0x8] sm:$0xf] %vm810_vm1, %v804_v29  ;;  %v805_v42 = vpack.c.bf16 %v797_v33, %v797_v33  ;;  %v226_v44 = vpop.f32.mrb[8].mxu0  ;;  %v836_v60 = vadd.f32 %v3189_v59, %v821_v49  ;;  %v822_v61 = vmul.f32 %v3181_v54, %v293_v56  ;;  %v295_v62 = vpop.f32.mrb[7].mxu1 }
  0xf5   :  { %v394_v47 = vadd.f32 %v3168_v36, %v226_v44  ;;  %v228_v48 = vpop.f32.mrb[9].mxu0  ;;  %2681 = vmatmul.mubr.msk.bf16.vlgmr.msra.gmra.mrb[16].mxu1 %vm159_vm0, %v407_v37  ;;  %v875_v5 = vadd.f32 %v3196_v1, %v860_v53  ;;  %v861_v6 = vmul.f32 %v3181_v54, %v295_v62 }
  0xf6   :  { %814 = vst.msk [vmem:[#allocation2 + $0xc] sm:$0xf] %vm810_vm1, %v805_v42  ;;  %v783_v51 = vmul.f32 %v3183_v55, %v228_v48  ;;  %v230_v52 = vpop.f32.mrb[10].mxu0  ;;  %v844_v38 = vpack.c.bf16 %v836_v60, %v836_v60  ;;  %v837_v9 = vadd.f32 %v3189_v59, %v822_v61 }
  0xf7   :  { %v395_v57 = vadd.f32 %v3168_v36, %v230_v52  ;;  %v232_v58 = vpop.f32.mrb[11].mxu0  ;;  %v402_v7 = vmax.f32 %v394_v47, 0.0  ;;  %v883_v12 = vpack.c.bf16 %v875_v5, %v875_v5  ;;  %v876_v15 = vadd.f32 %v3196_v1, %v861_v6 }
  0xf8   :  { %v798_v63 = vadd.f32 %v3176_v41, %v783_v51  ;;  %v784_v3 = vmul.f32 %v3208_v39, %v232_v58  ;;  %852 = vst.msk [vmem:[#allocation3 + $0x8] sm:$0xf] %vm810_vm1, %v844_v38  ;;  %v845_v18 = vpack.c.bf16 %v837_v9, %v837_v9 }
  0xf9   :  { %v403_v8 = vmax.f32 %v395_v57, 0.0  ;;  %891 = vst.msk [vmem:[#allocation4 + $0x8] sm:$0xf] %vm810_vm1, %v883_v12  ;;  %v884_v22 = vpack.c.bf16 %v876_v15, %v876_v15  ;;  %v299_v23 = vpop.f32.mrb[8].mxu1 }
  0xfa   :  { %v806_v10 = vpack.c.bf16 %v798_v63, %v798_v63  ;;  %v799_v11 = vadd.f32 %v3176_v41, %v784_v3  ;;  %853 = vst.msk [vmem:[#allocation3 + $0xc] sm:$0xf] %vm810_vm1, %v845_v18  ;;  %v823_v33 = vmul.f32 %v3183_v55, %v299_v23  ;;  %v301_v34 = vpop.f32.mrb[9].mxu1  ;;  %v2496_v23 = vld [vmem:[%s3660_s6] ss:$0 sm:$0xff] }
  0xfb   :  { %v408_v16 = vpack.c.bf16 %v403_v8, %v402_v7  ;;  %892 = vst.msk [vmem:[#allocation4 + $0xc] sm:$0xf] %vm810_vm1, %v884_v22  ;;  %v862_v43 = vmul.f32 %v3183_v55, %v301_v34  ;;  %v303_v42 = vpop.f32.mrb[10].mxu1  ;;  %v3300_v22 = vld [vmem:[%s3659_s11 + $0x4] ss:$12 sps:$4 sm:$0xff]  }
  0xfc   :  { %815 = vst.msk [vmem:[#allocation2 + $0x10] sm:$0xf] %vm810_vm1, %v806_v10  ;;  %v807_v21 = vpack.c.bf16 %v799_v11, %v799_v11  ;;  %v236_v54 = vpop.f32.mrb[12].mxu0  ;;  %v838_v46 = vadd.f32 %v3189_v59, %v823_v33  ;;  %v824_v47 = vmul.f32 %v3208_v39, %v303_v42  ;;  %v305_v48 = vpop.f32.mrb[11].mxu1 }
  0xfd   :  { %v396_v26 = vadd.f32 %v3168_v36, %v236_v54  ;;  %v238_v29 = vpop.f32.mrb[13].mxu0  ;;  %2684 = vmatprep.mubr.msk.bf16.mxu1 %vm159_vm0, %v408_v16  ;;  %v877_v51 = vadd.f32 %v3196_v1, %v862_v43  ;;  %v863_v52 = vmul.f32 %v3208_v39, %v305_v48 }
  0xfe   :  { %816 = vst.msk [vmem:[#allocation2 + $0x14] sm:$0xf] %vm810_vm1, %v807_v21  ;;  %v785_v35 = vmul.f32 %v3210_v40, %v238_v29  ;;  %v240_v37 = vpop.f32.mrb[14].mxu0  ;;  %v846_v57 = vpack.c.bf16 %v838_v46, %v838_v46  ;;  %v839_v55 = vadd.f32 %v3189_v59, %v824_v47 }
  0xff   :  { %v397_v44 = vadd.f32 %v3168_v36, %v240_v37  ;;  %v242_v45 = vpop.f32.mrb[15].mxu0  ;;  %v404_v53 = vmax.f32 %v396_v26, 0.0  ;;  %v885_v60 = vpack.c.bf16 %v877_v51, %v877_v51  ;;  %v878_v61 = vadd.f32 %v3196_v1, %v863_v52 }
 0x100   :  { %v800_v49 = vadd.f32 %v3176_v41, %v785_v35  ;;  %v786_v50 = vmul.f32 %v778_v17, %v242_v45  ;;  %854 = vst.msk [vmem:[#allocation3 + $0x10] sm:$0xf] %vm810_vm1, %v846_v57  ;;  %v847_v63 = vpack.c.bf16 %v839_v55, %v839_v55 }
 0x101   :  { %v405_v56 = vmax.f32 %v397_v44, 0.0  ;;  %893 = vst.msk [vmem:[#allocation4 + $0x10] sm:$0xf] %vm810_vm1, %v885_v60  ;;  %v886_v39 = vpack.c.bf16 %v878_v61, %v878_v61  ;;  %v309_v5 = vpop.f32.mrb[12].mxu1 }
 0x102   :  { %v808_v58 = vpack.c.bf16 %v800_v49, %v800_v49  ;;  %v801_v36 = vadd.f32 %v3176_v41, %v786_v50  ;;  %855 = vst.msk [vmem:[#allocation3 + $0x14] sm:$0xf] %vm810_vm1, %v847_v63  ;;  %v825_v41 = vmul.f32 %v3210_v40, %v309_v5  ;;  %v311_v6 = vpop.f32.mrb[13].mxu1 }
 0x103   :  { %v409_v62 = vpack.c.bf16 %v405_v56, %v404_v53  ;;  %894 = vst.msk [vmem:[#allocation4 + $0x14] sm:$0xf] %vm810_vm1, %v886_v39  ;;  %v864_v7 = vmul.f32 %v3210_v40, %v311_v6  ;;  %v313_v8 = vpop.f32.mrb[14].mxu1 }
 0x104   :  { %817 = vst.msk [vmem:[#allocation2 + $0x18] sm:$0xf] %vm810_vm1, %v808_v58  ;;  %v809_v3 = vpack.c.bf16 %v801_v36, %v801_v36  ;;  %v840_v38 = vadd.f32 %v3189_v59, %v825_v41  ;;  %v826_v9 = vmul.f32 %v778_v17, %v313_v8  ;;  %v315_v10 = vpop.f32.mrb[15].mxu1 }
 0x105   :  { %2685 = vmatmul.mubr.msk.bf16.gmra.mrb[20].mxu1 %vm159_vm0, %v409_v62  ;;  %v879_v11 = vadd.f32 %v3196_v1, %v864_v7  ;;  %v865_v12 = vmul.f32 %v778_v17, %v315_v10  ;;  %v2792_v17 = vld [vmem:[%s3678_s23 + $0x38] ss:$20 sps:$4 sm:$0xff]  }
 0x106   :  { %818 = vst.msk [vmem:[#allocation2 + $0x1c] sm:$0xf] %vm810_vm1, %v809_v3  ;;  %v848_v15 = vpack.c.bf16 %v840_v38, %v840_v38  ;;  %v841_v16 = vadd.f32 %v3189_v59, %v826_v9  ;;  %2666 = vmatprep.subr.bf16.mxu0 %v2792_v17  ;;  %v2944_v59 = vmov 0.0  }
 0x107   :  { %v887_v18 = vpack.c.bf16 %v879_v11, %v879_v11  ;;  %v880_v21 = vadd.f32 %v3196_v1, %v865_v12  ;;  %2667 = vmatpush3.bf16.msra.mxu0 %v2792_v17  ;;  %2696 = vmatprep.subr.bf16.mxu1 %v2944_v59  ;;  %v2793_v1 = vld [vmem:[%s3657_s7] sm:$0xff]  }
 0x108   :  { %856 = vst.msk [vmem:[#allocation3 + $0x18] sm:$0xf] %vm810_vm1, %v848_v15  ;;  %v849_v54 = vpack.c.bf16 %v841_v16, %v841_v16  ;;  %2688 = vmatprep.subr.bf16.mxu0 %v2944_v59  ;;  %2700 = vmatprep.mubr.msk.bf16.mxu1 %vm2945_vm2, %v2944_v59  ;;  %v3320_v16 = vld [vmem:[%s3659_s11] ss:$12 sps:$4 sm:$0xff]  }
 0x109   :  { %895 = vst.msk [vmem:[#allocation4 + $0x18] sm:$0xf] %vm810_vm1, %v887_v18  ;;  %v888_v40 = vpack.c.bf16 %v880_v21, %v880_v21  ;;  %v3325_v21 = vld [vmem:[%s3659_s11 + $0x1c] ss:$12 sps:$4 sm:$0xff]   ;;  %v2804_v17 = vld [vmem:[%s3659_s11 + $0x20] ss:$12 sps:$4 sm:$0xff]  }
 0x10a   :  { %857 = vst.msk [vmem:[#allocation3 + $0x1c] sm:$0xf] %vm810_vm1, %v849_v54  ;;  %2669 = vmatmul.mubr.msk.bf16.vlgmr.msra.gmra.mrb[16].mxu0 %vm159_vm0, %v3119_v27  ;;  %v2795_v27 = vld [vmem:[%s3658_s9] sm:$0xff]   ;;  %v2803_v54 = vld [vmem:[%s3659_s11 + $0x8] ss:$12 sps:$4 sm:$0xff]  }
 0x10b   :  { %896 = vst.msk [vmem:[#allocation4 + $0x1c] sm:$0xf] %vm810_vm1, %v888_v40  ;;  %2672 = vmatprep.mubr.msk.bf16.mxu0 %vm159_vm0, %v3137_v31  ;;  %2689 = vmatpush3.bf16.msra.mxu0 %v2793_v1  ;;  %v2794_v31 = vld [vmem:[%s3657_s7 + $0x8] sm:$0xff]   ;;  %v3336_v40 = vld [vmem:[%s3659_s11 + $0x18] ss:$12 sps:$4 sm:$0xff]  }
 0x10c   :  { %2690 = vmatprep.subr.bf16.mxu0 %v2944_v59  ;;  %2697 = vmatpush3.bf16.msra.mxu1 %v2795_v27 }
 0x10d   :  { %2698 = vmatprep.subr.bf16.mxu1 %v2944_v59 }
 0x10f   :  { %2691 = vmatpush3.bf16.msra.mxu0 %v2794_v31 }
 0x110   :  { %941 = vmatprep.subr.bf16.mxu0 %v3300_v22 }
 0x112   :  { %2673 = vmatmul.mubr.msk.bf16.gmra.mrb[20].mxu0 %vm159_vm0, %v3149_v32  ;;  %v2796_v32 = vld [vmem:[%s3658_s9 + $0x8] sm:$0xff]  }
 0x113   :  { %2699 = vmatpush3.bf16.msra.mxu1 %v2796_v32  ;;  %2692 = vmatprep.mubr.msk.bf16.mxu0 %vm2945_vm2, %v2944_v59 }
 0x114   :  { %2704 = vmatprep.subr.bf16.mxu1 %v2944_v59 }
 0x1c8   :  { %v2682_v26 = vpop.f32.mrb[16].mxu1 }
 0x1c9   :  { %v479_v29 = vpop.f32.mrb[17].mxu1  ;;  %v488_v33 = vadd.f32 %v2682_v26, %v2496_v23 }
 0x1ca   :  { %v480_v34 = vadd.f32 %v2496_v23, %v479_v29  ;;  %v2683_v35 = vpop.f32.mrb[18].mxu1 }
 0x1cb   :  { %v482_v37 = vpop.f32.mrb[19].mxu1  ;;  %v491_v42 = vadd.f32 %v2683_v35, %v2496_v23  ;;  %v512_v45 = vmax.f32 %v488_v33, 0.0  ;;  %v2806_v35 = vld [vmem:[%s3659_s11 + $0x20] ss:$12 sps:$4 sm:$0xff]  }
 0x1cc   :  { %v510_v43 = vmax.f32 %v480_v34, 0.0  ;;  %v483_v44 = vadd.f32 %v2496_v23, %v482_v37  ;;  %v2805_v34 = vld [vmem:[%s3659_s11 + $0x8] ss:$12 sps:$4 sm:$0xff]   ;;  %v2507_v37 = vld [vmem:[%s3661_s10] ss:$0 sm:$0xff] }
 0x1cd   :  { %v513_v48 = vmax.f32 %v491_v42, 0.0  ;;  %v521_v51 = vsel %vm159_vm0, %v512_v45, 0.0 }
 0x1ce   :  { %v511_v46 = vmax.f32 %v483_v44, 0.0  ;;  %v518_v47 = vsel %vm159_vm0, %v510_v43, 0.0 }
 0x1cf   :  { %v523_v53 = vsel %vm159_vm0, %v513_v48, 0.0 }
 0x1d0   :  { %v519_v49 = vsel %vm159_vm0, %v511_v46, 0.0 }
 0x1d1   :  { %v520_v50 = vadd.f32 %v519_v49, %v518_v47 }
 0x1d3   :  { %v522_v52 = vadd.f32 %v521_v51, %v520_v50 }
 0x1d5   :  { %v524_v56 = vadd.f32 %v523_v53, %v522_v52  ;;  %v1022_v52 = vld [vmem:[#allocation2] sm:$0xf] }
 0x1d8   :  { %v2686_v57 = vpop.f32.mrb[20].mxu1 }
 0x1d9   :  { %v495_v55 = vpop.f32.mrb[21].mxu1  ;;  %v504_v58 = vadd.f32 %v2686_v57, %v2496_v23  ;;  %v1031_v57 = vld [vmem:[#allocation3] sm:$0xf] }
 0x1da   :  { %v496_v36 = vadd.f32 %v2496_v23, %v495_v55  ;;  %v2687_v60 = vpop.f32.mrb[22].mxu1 }
 0x1db   :  { %v498_v61 = vpop.f32.mrb[23].mxu1  ;;  %v507_v63 = vadd.f32 %v2687_v60, %v2496_v23  ;;  %v516_v39 = vmax.f32 %v504_v58, 0.0 }
 0x1dc   :  { %v514_v62 = vmax.f32 %v496_v36, 0.0  ;;  %v499_v3 = vadd.f32 %v2496_v23, %v498_v61  ;;  %v1032_v61 = vunpack.c.l.bf16 %v1031_v57 }
 0x1dd   :  { %v517_v7 = vmax.f32 %v507_v63, 0.0  ;;  %v529_v9 = vsel %vm159_vm0, %v516_v39, 0.0  ;;  %v3358_v1 = vpop.f32.mrb[16].mxu0 }
 0x1de   :  { %v525_v5 = vsel %vm159_vm0, %v514_v62, 0.0  ;;  %v515_v41 = vmax.f32 %v499_v3, 0.0  ;;  %v3360_v27 = vpop.f32.mrb[17].mxu0 }
 0x1df   :  { %v526_v6 = vadd.f32 %v525_v5, %v524_v56  ;;  %v531_v11 = vsel %vm159_vm0, %v517_v7, 0.0  ;;  %v3362_v31 = vpop.f32.mrb[18].mxu0  ;;  %v1023_v56 = vunpack.c.l.bf16 %v1022_v52  ;;  %v2503_v7 = vld [vmem:[%s3662_s8] ss:$0 sm:$0xff] }
 0x1e0   :  { %v527_v8 = vsel %vm159_vm0, %v515_v41, 0.0  ;;  %v3364_v32 = vpop.f32.mrb[19].mxu0 }
 0x1e1   :  { %v528_v38 = vadd.f32 %v527_v8, %v526_v6  ;;  %v74_v8 = vld [vmem:[%s3663_s2] sm:$0xff] }
 0x1e3   :  { %v530_v10 = vadd.f32 %v529_v9, %v528_v38 }
 0x1e5   :  { %v532_v12 = vadd.f32 %v531_v11, %v530_v10  ;;  %v3366_v23 = vpop.f32.mrb[20].mxu0 }
 0x1e6   :  { %v3368_v26 = vpop.f32.mrb[21].mxu0 }
 0x1e7   :  { %v534_v15 = vmul.f32 0.125, %v532_v12  ;;  %v3370_v29 = vpop.f32.mrb[22].mxu0 }
 0x1e8   :  { %v3372_v33 = vpop.f32.mrb[23].mxu0 }
 0x1e9   :  { %v535_v18 = vpack.c.bf16 %v534_v15, %v534_v15 }
 0x1eb   :  { %2693 = vmatmul.mubr.msk.bf16.vlgmr.msra.gmra.mrb[24].mxu0 %vm159_vm0, %v535_v18  ;;  %2701 = vmatmul.mubr.msk.bf16.vlgmr.msra.gmra.mrb[24].mxu1 %vm159_vm0, %v535_v18 }
 0x1ec   :  { %942 = vmatpush1.bf16.msra.mxu0 %v3320_v16  ;;  %973 = vmatprep.mubr.bf16.mxu0 %v2943_v2 }
 0x1ed   :  { %943 = vmatprep.subr.bf16.mxu0 %v3325_v21  ;;  %2705 = vmatpush3.bf16.msra.mxu1 %v2803_v54 }
 0x1ee   :  { %2706 = vmatprep.subr.bf16.mxu1 %v2944_v59  ;;  %2708 = vmatprep.mubr.msk.bf16.mxu1 %vm2945_vm2, %v2944_v59 }
 0x1f0   :  { %944 = vmatpush1.bf16.msra.mxu0 %v3336_v40 }
 0x1f1   :  { %2707 = vmatpush3.bf16.msra.mxu1 %v2804_v17  ;;  %1101 = vmatprep.subr.bf16.mxu0 %v3300_v22 }
 0x1f2   :  { %2712 = vmatprep.subr.bf16.mxu1 %v2944_v59 }
 0x1f3   :  { %974 = vmatmul.mubr.bf16.vlgmr.msra.gmra.mrb[28].mxu0 %v2943_v2 }
 0x1f4   :  { %2709 = vmatmul.mubr.bf16.vlgmr.msra.gmra.mrb[28].mxu1 %v2943_v2  ;;  %1102 = vmatpush1.bf16.msra.mxu0 %v3320_v16 }
 0x1f5   :  { %1103 = vmatprep.subr.bf16.mxu0 %v3325_v21  ;;  %1133 = vmatprep.mubr.bf16.mxu0 %v2943_v2 }
 0x1f6   :  { %2716 = vmatprep.mubr.msk.bf16.mxu1 %vm2945_vm2, %v2944_v59  ;;  %2713 = vmatpush3.bf16.msra.mxu1 %v2805_v34  ;;  %v3395_v34 = vld [vmem:[%s3664_s15] ss:$0 sm:$0xff] }
 0x1f7   :  { %2714 = vmatprep.subr.bf16.mxu1 %v2944_v59 }
 0x1f8   :  { %1104 = vmatpush1.bf16.msra.mxu0 %v3336_v40 }
 0x1f9   :  { %1259 = vmatprep.subr.bf16.mxu0 %v3300_v22 }
 0x1fa   :  { %2715 = vmatpush3.bf16.msra.mxu1 %v2806_v35 }
 0x1fb   :  { %2720 = vmatprep.subr.bf16.mxu1 %v2944_v59 }
 0x2be   :  { %v596_v43 = vpop.f32.mrb[24].mxu0  ;;  %v659_v42 = vpop.f32.mrb[24].mxu1 }
 0x2bf   :  { %v660_v44 = vadd.f32 %v2507_v37, %v659_v42  ;;  %v2694_v45 = vpop.f32.mrb[25].mxu0  ;;  %v2702_v46 = vpop.f32.mrb[25].mxu1  ;;  %v597_v10 = vadd.f32 %v2503_v7, %v596_v43  ;;  %v3398_v43 = vld [vmem:[#allocation4] sm:$0xff]  }
 0x2c0   :  { %v599_v47 = vpop.f32.mrb[26].mxu0  ;;  %v662_v48 = vpop.f32.mrb[26].mxu1 }
 0x2c1   :  { %v665_v49 = vmul.f32 0.5, %v660_v44  ;;  %v2695_v50 = vpop.f32.mrb[27].mxu0  ;;  %v2703_v51 = vpop.f32.mrb[27].mxu1  ;;  %v1041_v44 = vunpack.c.l.bf16 %v3398_v43 }
 0x2c3   :  { %v666_v53 = vmul.f32 1.442695, %v665_v49 }
 0x2c5   :  { %2825 = vpow2.f32 %v666_v53 }
 0x2c6   :  { %v975_v55 = vpop.f32.mrb[28].mxu0 }
 0x2c7   :  { %v1024_v58 = vadd.f32 %v1023_v56, %v975_v55  ;;  %v977_v36 = vpop.f32.mrb[29].mxu0  ;;  %v1016_v60 = vpop.f32.mrb[28].mxu1 }
 0x2c8   :  { %v979_v62 = vpop.f32.mrb[30].mxu0  ;;  %v2710_v63 = vpop.f32.mrb[29].mxu1  ;;  %v1033_v41 = vadd.f32 %v1032_v61, %v977_v36  ;;  %v1048_v37 = vadd.f32 %v3395_v34, %v1016_v60  ;;  %v2808_v36 = vld [vmem:[%s3659_s11 + $0x20] ss:$12 sps:$4 sm:$0xff]  }
 0x2c9   :  { %v2520_v3 = vmul.f32 -1.442695, %v1024_v58  ;;  %v980_v39 = vpop.f32.mrb[31].mxu0  ;;  %v1019_v5 = vpop.f32.mrb[30].mxu1  ;;  %v2807_v58 = vld [vmem:[%s3659_s11 + $0x8] ss:$12 sps:$4 sm:$0xff]   ;;  %v26_v62 = vstv %s3665_s17 }
 0x2ca   :  { %v2711_v6 = vpop.f32.mrb[31].mxu1  ;;  %v2521_v38 = vmul.f32 -1.442695, %v1033_v41  ;;  %27 = vst [vmem:[#allocation6] sm:$0x1] %v26_v62 }
 0x2cb   :  { %2827 = vpow2.f32 %v2520_v3  ;;  %v1183_v63 = vld [vmem:[#allocation2 + $0x4] sm:$0xf] }
 0x2cc   :  { %2829 = vpow2.f32 %v2521_v38  ;;  %v1184_v3 = vunpack.c.l.bf16 %v1183_v63  ;;  %v1193_v39 = vld [vmem:[#allocation3 + $0x4] sm:$0xf] }
 0x2cd   :  { %v1194_v38 = vunpack.c.l.bf16 %v1193_v39 }
 0x2cf   :  { %v2826_v9 = vpop.eup %2825 }
 0x2d0   :  { %v668_v11 = vmul.f32 %v2826_v9, %v74_v8 }
 0x2d2   :  { %v669_v12 = vadd.f32 %v668_v11, %v597_v10 }
 0x2d4   :  { %v671_v15 = vsel %vm670_vm3, %v669_v12, -inf }
 0x2d5   :  { %v2828_v18 = vpop.eup %2827  ;;  %672 = vmax.xlane.f32.xlu1 %v671_v15 }
 0x2d6   :  { %v1028_v54 = vadd.f32 1.0, %v2828_v18  ;;  %v2830_v17 = vpop.eup %2829 }
 0x2d7   :  { %v1037_v35 = vadd.f32 1.0, %v2830_v17 }
 0x2d8   :  { %2831 = vrcp.f32 %v1028_v54 }
 0x2d9   :  { %2833 = vrcp.f32 %v1037_v35 }
 0x2e2   :  { %v2832_v42 = vpop.eup %2831 }
 0x2e3   :  { %v1049_v45 = vmul.f32 %v2832_v42, %v1048_v37  ;;  %v2834_v47 = vpop.eup %2833 }
 0x2e4   :  { %v1052_v48 = vsub.f32 1.0, %v2834_v47  ;;  %v1054_v50 = vmul.f32 0.0, %v2834_v47 }
 0x2e5   :  { %v1050_v46 = vadd.f32 %v1049_v45, %v1041_v44 }
 0x2e7   :  { %2835 = vtanh.f32 %v1050_v46  ;;  %v1204_v46 = vunpack.c.h.bf16 %v3398_v43 }
 0x2f1   :  { %v2836_v49 = vpop.eup %2835 }
 0x2f2   :  { %v1053_v51 = vmul.f32 %v2836_v49, %v1052_v48 }
 0x2f4   :  { %v1055_v52 = vadd.f32 %v1054_v50, %v1053_v51 }
 0x2f6   :  { %v1056_v53 = vpack.c.bf16 %v1055_v52, %v1055_v52 }
 0x2f8   :  { %1057 = vst.msk [vmem:[#allocation5] sm:$0xf] %vm810_vm1, %v1056_v53  ;;  %2529 = vmatmul.mubr.msk.bf16.vlgmr.msra.gmra.mrb[32].mxu0 %vm159_vm0, %v1056_v53  ;;  %2717 = vmatmul.mubr.msk.bf16.vlgmr.msra.gmra.mrb[32].mxu1 %vm159_vm0, %v1056_v53 }
 0x2f9   :  { %1260 = vmatpush1.bf16.msra.mxu0 %v3320_v16  ;;  %1291 = vmatprep.mubr.bf16.mxu0 %v2943_v2 }
 0x2fa   :  { %1261 = vmatprep.subr.bf16.mxu0 %v3325_v21  ;;  %2724 = vmatprep.mubr.msk.bf16.mxu1 %vm2945_vm2, %v2944_v59 }
 0x2fb   :  { %2721 = vmatpush3.bf16.msra.mxu1 %v2807_v58  ;;  %v3445_v58 = vld [vmem:[%s3666_s16] ss:$0 sm:$0xff] }
 0x2fc   :  { %2722 = vmatprep.subr.bf16.mxu1 %v2944_v59 }
 0x2fd   :  { %1262 = vmatpush1.bf16.msra.mxu0 %v3336_v40 }
 0x2fe   :  { %1417 = vmatprep.subr.bf16.mxu0 %v3300_v22 }
 0x2ff   :  { %2723 = vmatpush3.bf16.msra.mxu1 %v2808_v36 }
 0x300   :  { %2728 = vmatprep.subr.bf16.mxu1 %v2944_v59 }
 0x362   :  { %v673_v56 = vpop.xlane.xlu1 %672 }
 0x363   :  { %v674_v57 = vsub.f32 %v669_v12, %v673_v56 }
 0x365   :  { %v675_v55 = vmul.f32 1.442695, %v674_v57 }
 0x367   :  { %2837 = vpow2.f32 %v675_v55 }
 0x371   :  { %v3418_v60 = vpop.eup %2837 }
 0x372   :  { %v677_v61 = vsel %vm670_vm3, %v3418_v60, 0.0 }
 0x373   :  { %678 = vadd.xlane.f32.xlu0 %v677_v61 }
 0x3cb   :  { %v1135_v5 = vpop.f32.mrb[32].mxu0  ;;  %v1176_v41 = vpop.f32.mrb[32].mxu1 }
 0x3cc   :  { %v1185_v6 = vadd.f32 %v1184_v3, %v1135_v5  ;;  %v1137_v7 = vpop.f32.mrb[33].mxu0  ;;  %v2718_v8 = vpop.f32.mrb[33].mxu1  ;;  %v1205_v44 = vadd.f32 %v3395_v34, %v1176_v41 }
 0x3cd   :  { %v1139_v9 = vpop.f32.mrb[34].mxu0  ;;  %v1179_v10 = vpop.f32.mrb[34].mxu1  ;;  %v1195_v18 = vadd.f32 %v1194_v38, %v1137_v7 }
 0x3ce   :  { %v2531_v11 = vmul.f32 -1.442695, %v1185_v6  ;;  %v1140_v12 = vpop.f32.mrb[35].mxu0  ;;  %v2719_v15 = vpop.f32.mrb[35].mxu1 }
 0x3cf   :  { %v2532_v54 = vmul.f32 -1.442695, %v1195_v18 }
 0x3d0   :  { %2839 = vpow2.f32 %v2531_v11 }
 0x3d1   :  { %2841 = vpow2.f32 %v2532_v54 }
 0x3da   :  { %v2840_v17 = vpop.eup %2839 }
 0x3db   :  { %v1189_v35 = vadd.f32 1.0, %v2840_v17  ;;  %v2842_v37 = vpop.eup %2841 }
 0x3dc   :  { %v1199_v42 = vadd.f32 1.0, %v2842_v37 }
 0x3dd   :  { %2843 = vrcp.f32 %v1189_v35 }
 0x3de   :  { %2845 = vrcp.f32 %v1199_v42 }
 0x3e7   :  { %v2844_v45 = vpop.eup %2843 }
 0x3e8   :  { %v1206_v47 = vmul.f32 %v2844_v45, %v1205_v44  ;;  %v2846_v49 = vpop.eup %2845 }
 0x3e9   :  { %v1209_v50 = vsub.f32 1.0, %v2846_v49  ;;  %v1211_v53 = vmul.f32 %v2846_v49, %v1055_v52  ;;  %v1351_v49 = vld [vmem:[#allocation3 + $0x8] sm:$0xff]  }
 0x3ea   :  { %v1207_v48 = vadd.f32 %v1206_v47, %v1204_v46  ;;  %v1341_v47 = vld [vmem:[#allocation2 + $0x8] sm:$0xff]  }
 0x3ec   :  { %2847 = vtanh.f32 %v1207_v48  ;;  %v1342_v48 = vunpack.c.l.bf16 %v1341_v47 }
 0x3f6   :  { %v2848_v51 = vpop.eup %2847 }
 0x3f7   :  { %v1210_v56 = vmul.f32 %v2848_v51, %v1209_v50 }
 0x3f9   :  { %v3428_v57 = vadd.f32 %v1211_v53, %v1210_v56 }
 0x3fb   :  { %v1213_v55 = vpack.c.bf16 %v3428_v57, %v3428_v57 }
 0x3fd   :  { %1215 = vst.msk [vmem:[#allocation5 + $0x4] sm:$0xf] %vm810_vm1, %v1213_v55  ;;  %2539 = vmatmul.mubr.msk.bf16.vlgmr.msra.gmra.mrb[36].mxu0 %vm159_vm0, %v1213_v55  ;;  %2725 = vmatmul.mubr.msk.bf16.vlgmr.msra.gmra.mrb[36].mxu1 %vm159_vm0, %v1213_v55 }
 0x3fe   :  { %1418 = vmatpush1.bf16.msra.mxu0 %v3320_v16  ;;  %1449 = vmatprep.mubr.bf16.mxu0 %v2943_v2 }
 0x3ff   :  { %1419 = vmatprep.subr.bf16.mxu0 %v3325_v21  ;;  %2732 = vmatprep.mubr.msk.bf16.mxu1 %vm2945_vm2, %v2944_v59 }
 0x400   :  { %v679_v43 = vpop.xlane.xlu0 %678 }
 0x401   :  { %2849 = vrcp.f32 %v679_v43  ;;  %v1352_v43 = vunpack.c.l.bf16 %v1351_v49 }
 0x402   :  { %1420 = vmatpush1.bf16.msra.mxu0 %v3336_v40 }
 0x403   :  { %1575 = vmatprep.subr.bf16.mxu0 %v3300_v22 }
 0x404   :  { %v2604_v52 = vld [vmem:[#allocation5] sm:$0xff]  }
 0x405   :  { %v2606_v36 = vunpack.c.h.bf16 %v2604_v52  ;;  %v2605_v61 = vunpack.c.l.bf16 %v2604_v52 }
 0x407   :  { %v2189_v62 = vmul.f32 %v2606_v36, %v3445_v58  ;;  %v2188_v63 = vmul.f32 %v2605_v61, %v3445_v58 }
 0x409   :  { %v2199_v3 = vsel %vm159_vm0, %v2189_v62, 0.0  ;;  %v2196_v39 = vsel %vm159_vm0, %v2188_v63, 0.0 }
 0x40a   :  { %2200 = vadd.xlane.f32.xlu0 %v2199_v3  ;;  %2197 = vadd.xlane.f32.xlu1 %v2196_v39 }
 0x40b   :  { %v2850_v5 = vpop.eup %2849 }
 0x40c   :  { %v681_v41 = vmul.f32 %v2850_v5, %v3418_v60 }
 0x40e   :  { %682 = vst.msk [vmem:[%s3667_s20] sm:$0xff] %vm670_vm3, %v681_v41  ;;  %v684_v6 = vmul.f32 %v681_v41, %v3364_v32  ;;  %v683_v7 = vmul.f32 %v681_v41, %v3360_v27  ;;  %v685_v9 = vmul.f32 %v3358_v1, %v681_v41  ;;  %v686_v60 = vmul.f32 %v3362_v31, %v681_v41 }
 0x40f   :  { %v687_v12 = vmul.f32 %v681_v41, %v3368_v26  ;;  %v688_v32 = vmul.f32 %v681_v41, %v3372_v33  ;;  %v689_v1 = vmul.f32 %v3366_v23, %v681_v41  ;;  %v690_v31 = vmul.f32 %v3370_v29, %v681_v41  ;;  %v2594_v26 = vld [vmem:[#allocation6] ss:$0 sm:$0xff]  ;;  %v2809_v23 = vld [vmem:[%s3659_s11 + $0x8] ss:$12 sps:$4 sm:$0xff]  }
 0x410   :  { %v694_v8 = vsel %vm670_vm3, %v684_v6, 0.0  ;;  %v691_v38 = vsel %vm670_vm3, %v683_v7, 0.0  ;;  %v697_v10 = vsel %vm670_vm3, %v685_v9, 0.0  ;;  %v700_v11 = vsel %vm670_vm3, %v686_v60, 0.0  ;;  %2729 = vmatpush3.bf16.msra.mxu1 %v2809_v23  ;;  %v2810_v29 = vld [vmem:[%s3659_s11 + $0x20] ss:$12 sps:$4 sm:$0xff]  }
 0x411   :  { %695 = vadd.xlane.f32.xlu0 %v694_v8  ;;  %692 = vadd.xlane.f32.xlu1 %v691_v38  ;;  %v703_v27 = vsel %vm670_vm3, %v687_v12, 0.0  ;;  %v706_v15 = vsel %vm670_vm3, %v688_v32, 0.0  ;;  %v709_v18 = vsel %vm670_vm3, %v689_v1, 0.0  ;;  %v712_v54 = vsel %vm670_vm3, %v690_v31, 0.0  ;;  %v1361_v8 = vld [vmem:[#allocation4 + $0x8] sm:$0xff]  }
 0x412   :  { %2730 = vmatprep.subr.bf16.mxu1 %v2944_v59 }
 0x414   :  { %2731 = vmatpush3.bf16.msra.mxu1 %v2810_v29 }
 0x415   :  { %698 = vadd.xlane.f32.xlu1 %v697_v10  ;;  %2736 = vmatprep.subr.bf16.mxu1 %v2944_v59  ;;  %v1362_v10 = vunpack.c.l.bf16 %v1361_v8 }
 0x419   :  { %701 = vadd.xlane.f32.xlu1 %v700_v11 }
 0x41d   :  { %704 = vadd.xlane.f32.xlu1 %v703_v27 }
 0x421   :  { %707 = vadd.xlane.f32.xlu1 %v706_v15 }
 0x425   :  { %710 = vadd.xlane.f32.xlu1 %v709_v18 }
 0x429   :  { %713 = vadd.xlane.f32.xlu1 %v712_v54  ;;  %v2812_v54 = vld [vmem:[%s3659_s11 + $0x20] ss:$12 sps:$4 sm:$0xff]  }
 0x43a   :  { %2227 = vperm.xlu1 %2771, %v2594_v26   ;;  %v1500_v26 = vunpack.c.h.bf16 %v1341_v47 }
 0x43e   :  { %2307 = vbcast.lane.b32.xlu1 %v3093_v19, 256 }
 0x442   :  { %2314 = vbcast.lane.b32.xlu1 %v3082_v14, 256 }
 0x446   :  { %2328 = vbcast.lane.b32.xlu1 %v3111_v24, 256 }
 0x44a   :  { %2342 = vbcast.lane.b32.xlu1 %v3123_v28, 256 }
 0x497   :  { %v2198_v19 = vpop.xlane.xlu1 %2197 }
 0x49e   :  { %v693_v14 = vpop.xlane.xlu1 %692 }
 0x49f   :  { %v715_v44 = vmul.f32 0.125, %v693_v14 }
 0x4a2   :  { %v3484_v33 = vpop.xlane.xlu1 %698 }
 0x4a6   :  { %v3486_v24 = vpop.xlane.xlu1 %701 }
 0x4aa   :  { %v3488_v28 = vpop.xlane.xlu1 %704 }
 0x4ae   :  { %v3490_v17 = vpop.xlane.xlu1 %707 }
 0x4b2   :  { %v3492_v35 = vpop.xlane.xlu1 %710 }
 0x4b6   :  { %v3494_v37 = vpop.xlane.xlu1 %713 }
 0x4ba   :  { %v3496_v42 = vpop.permute.xlu1 %2227 }
 0x4bb   :  { %v2230_v45 = vadd.f32 %v3496_v42, %v2198_v19  ;;  %v1510_v19 = vunpack.c.h.bf16 %v1351_v49 }
 0x4bd   :  { %v3499_v46 = vadd.f32 %v2230_v45, %v715_v44 }
 0x4d0   :  { %v1293_v50 = vpop.f32.mrb[36].mxu0  ;;  %v1334_v51 = vpop.f32.mrb[36].mxu1 }
 0x4d1   :  { %v1343_v53 = vadd.f32 %v1342_v48, %v1293_v50  ;;  %v1295_v56 = vpop.f32.mrb[37].mxu0  ;;  %v2726_v55 = vpop.f32.mrb[37].mxu1  ;;  %v1363_v38 = vadd.f32 %v3395_v34, %v1334_v51 }
 0x4d2   :  { %v1297_v52 = vpop.f32.mrb[38].mxu0  ;;  %v1337_v36 = vpop.f32.mrb[38].mxu1  ;;  %v1353_v3 = vadd.f32 %v1352_v43, %v1295_v56 }
 0x4d3   :  { %v2541_v61 = vmul.f32 -1.442695, %v1343_v53  ;;  %v1298_v62 = vpop.f32.mrb[39].mxu0  ;;  %v2727_v63 = vpop.f32.mrb[39].mxu1 }
 0x4d4   :  { %v2542_v39 = vmul.f32 -1.442695, %v1353_v3  ;;  %v1520_v63 = vunpack.c.h.bf16 %v1361_v8 }
 0x4d5   :  { %2851 = vpow2.f32 %v2541_v61 }
 0x4d6   :  { %2853 = vpow2.f32 %v2542_v39 }
 0x4df   :  { %v2852_v5 = vpop.eup %2851 }
 0x4e0   :  { %v1347_v41 = vadd.f32 1.0, %v2852_v5  ;;  %v2854_v6 = vpop.eup %2853 }
 0x4e1   :  { %v1357_v7 = vadd.f32 1.0, %v2854_v6 }
 0x4e2   :  { %2855 = vrcp.f32 %v1347_v41 }
 0x4e3   :  { %2857 = vrcp.f32 %v1357_v7 }
 0x4ec   :  { %v2856_v9 = vpop.eup %2855 }
 0x4ed   :  { %v1364_v60 = vmul.f32 %v2856_v9, %v1363_v38  ;;  %v2858_v12 = vpop.eup %2857 }
 0x4ee   :  { %v1367_v27 = vsub.f32 1.0, %v2858_v12  ;;  %v1369_v15 = vmul.f32 %v2858_v12, %v3428_v57  ;;  %v2811_v57 = vld [vmem:[%s3659_s11 + $0x8] ss:$12 sps:$4 sm:$0xff]  }
 0x4ef   :  { %v1365_v11 = vadd.f32 %v1364_v60, %v1362_v10 }
 0x4f1   :  { %2859 = vtanh.f32 %v1365_v11 }
 0x4fb   :  { %v2860_v32 = vpop.eup %2859 }
 0x4fc   :  { %v1368_v1 = vmul.f32 %v2860_v32, %v1367_v27 }
 0x4fe   :  { %v1370_v18 = vadd.f32 %v1369_v15, %v1368_v1  ;;  %v2813_v1 = vld [vmem:[%s3659_s11 + $0x8] ss:$12 sps:$4 sm:$0xff]  }
 0x500   :  { %v1371_v31 = vpack.c.bf16 %v1370_v18, %v1370_v18 }
 0x502   :  { %1373 = vst.msk [vmem:[#allocation5 + $0x8] sm:$0xf] %vm810_vm1, %v1371_v31  ;;  %2549 = vmatmul.mubr.msk.bf16.vlgmr.msra.gmra.mrb[40].mxu0 %vm159_vm0, %v1371_v31  ;;  %2733 = vmatmul.mubr.msk.bf16.vlgmr.msra.gmra.mrb[40].mxu1 %vm159_vm0, %v1371_v31 }
 0x503   :  { %1576 = vmatpush1.bf16.msra.mxu0 %v3320_v16  ;;  %1607 = vmatprep.mubr.bf16.mxu0 %v2943_v2 }
 0x504   :  { %1577 = vmatprep.subr.bf16.mxu0 %v3325_v21  ;;  %2740 = vmatprep.mubr.msk.bf16.mxu1 %vm2945_vm2, %v2944_v59 }
 0x505   :  { %2737 = vmatpush3.bf16.msra.mxu1 %v2811_v57 }
 0x506   :  { %2738 = vmatprep.subr.bf16.mxu1 %v2944_v59 }
 0x507   :  { %1578 = vmatpush1.bf16.msra.mxu0 %v3336_v40 }
 0x508   :  { %1733 = vmatprep.subr.bf16.mxu0 %v3300_v22 }
 0x509   :  { %2739 = vmatpush3.bf16.msra.mxu1 %v2812_v54  ;;  %v717_v54 = vmul.f32 0.125, %v3484_v33 }
 0x50a   :  { %2744 = vmatprep.subr.bf16.mxu1 %v2944_v59 }
 0x5d5   :  { %v1451_v23 = vpop.f32.mrb[40].mxu0  ;;  %v1492_v29 = vpop.f32.mrb[40].mxu1 }
 0x5d6   :  { %v1501_v14 = vadd.f32 %v1500_v26, %v1451_v23  ;;  %v1453_v44 = vpop.f32.mrb[41].mxu0  ;;  %v2734_v45 = vpop.f32.mrb[41].mxu1  ;;  %v1521_v62 = vadd.f32 %v3395_v34, %v1492_v29  ;;  %v1657_v29 = vld [vmem:[#allocation2 + $0x10] sm:$0xff]  }
 0x5d7   :  { %v1511_v48 = vadd.f32 %v1510_v19, %v1453_v44  ;;  %v1455_v50 = vpop.f32.mrb[42].mxu0  ;;  %v1495_v51 = vpop.f32.mrb[42].mxu1  ;;  %v1658_v19 = vunpack.c.l.bf16 %v1657_v29 }
 0x5d8   :  { %v2551_v53 = vmul.f32 -1.442695, %v1501_v14  ;;  %v1456_v56 = vpop.f32.mrb[43].mxu0  ;;  %v2735_v55 = vpop.f32.mrb[43].mxu1  ;;  %v1667_v14 = vld [vmem:[#allocation3 + $0x10] sm:$0xff]  }
 0x5d9   :  { %v2552_v43 = vmul.f32 -1.442695, %v1511_v48 }
 0x5da   :  { %2861 = vpow2.f32 %v2551_v53  ;;  %v1668_v53 = vunpack.c.l.bf16 %v1667_v14 }
 0x5db   :  { %2863 = vpow2.f32 %v2552_v43 }
 0x5e4   :  { %v2862_v52 = vpop.eup %2861 }
 0x5e5   :  { %v1505_v36 = vadd.f32 1.0, %v2862_v52  ;;  %v2864_v61 = vpop.eup %2863 }
 0x5e6   :  { %v1515_v47 = vadd.f32 1.0, %v2864_v61 }
 0x5e7   :  { %2865 = vrcp.f32 %v1505_v36 }
 0x5e8   :  { %2867 = vrcp.f32 %v1515_v47 }
 0x5f1   :  { %v2866_v49 = vpop.eup %2865 }
 0x5f2   :  { %v1522_v3 = vmul.f32 %v2866_v49, %v1521_v62  ;;  %v2868_v5 = vpop.eup %2867 }
 0x5f3   :  { %v1525_v41 = vsub.f32 1.0, %v2868_v5  ;;  %v1527_v7 = vmul.f32 %v2868_v5, %v1370_v18  ;;  %v3548_v18 = vpop.xlane.xlu0 %2200 }
 0x5f4   :  { %v1523_v39 = vadd.f32 %v1522_v3, %v1520_v63  ;;  %v1677_v3 = vld [vmem:[#allocation4 + $0x10] sm:$0xff]  }
 0x5f6   :  { %2869 = vtanh.f32 %v1523_v39 }
 0x5f7   :  { %v3550_v31 = vpop.xlane.xlu0 %695 }
 0x600   :  { %v2870_v6 = vpop.eup %2869 }
 0x601   :  { %v1526_v38 = vmul.f32 %v2870_v6, %v1525_v41  ;;  %v1678_v41 = vunpack.c.l.bf16 %v1677_v3 }
 0x603   :  { %v3522_v9 = vadd.f32 %v1527_v7, %v1526_v38 }
 0x605   :  { %v1529_v10 = vpack.c.bf16 %v3522_v9, %v3522_v9 }
 0x607   :  { %1531 = vst.msk [vmem:[#allocation5 + $0xc] sm:$0xf] %vm810_vm1, %v1529_v10  ;;  %2559 = vmatmul.mubr.msk.bf16.vlgmr.msra.gmra.mrb[44].mxu0 %vm159_vm0, %v1529_v10  ;;  %2741 = vmatmul.mubr.msk.bf16.vlgmr.msra.gmra.mrb[44].mxu1 %vm159_vm0, %v1529_v10 }
 0x608   :  { %1734 = vmatpush1.bf16.msra.mxu0 %v3320_v16  ;;  %1765 = vmatprep.mubr.bf16.mxu0 %v2943_v2 }
 0x609   :  { %1735 = vmatprep.subr.bf16.mxu0 %v3325_v21  ;;  %2748 = vmatprep.mubr.msk.bf16.mxu1 %vm2945_vm2, %v2944_v59 }
 0x60a   :  { %2745 = vmatpush3.bf16.msra.mxu1 %v2813_v1  ;;  %v1826_v1 = vunpack.c.h.bf16 %v1667_v14 }
 0x60b   :  { %2746 = vmatprep.subr.bf16.mxu1 %v2944_v59 }
 0x60c   :  { %1736 = vmatpush1.bf16.msra.mxu0 %v3336_v40 }
 0x60d   :  { %1891 = vmatprep.subr.bf16.mxu0 %v3300_v22  ;;  %v2814_v22 = vld [vmem:[%s3659_s11 + $0x20] ss:$12 sps:$4 sm:$0xff]  }
 0x60e   :  { %v2619_v8 = vld [vmem:[#allocation5 + $0x8] sm:$0xff]   ;;  %2747 = vmatpush3.bf16.msra.mxu1 %v2814_v22 }
 0x60f   :  { %v2609_v60 = vunpack.c.l.bf16 %v2619_v8  ;;  %v2610_v11 = vunpack.c.h.bf16 %v2619_v8  ;;  %2752 = vmatprep.subr.bf16.mxu1 %v2944_v59 }
 0x611   :  { %v2190_v12 = vmul.f32 %v2609_v60, %v3445_v58  ;;  %v2191_v32 = vmul.f32 %v2610_v11, %v3445_v58 }
 0x613   :  { %v2202_v27 = vsel %vm159_vm0, %v2190_v12, 0.0  ;;  %v2205_v15 = vsel %vm159_vm0, %v2191_v32, 0.0  ;;  %v2816_v32 = vld [vmem:[%s3659_s11 + $0x20] ss:$12 sps:$4 sm:$0xff]  }
 0x614   :  { %2203 = vadd.xlane.f32.xlu0 %v2202_v27 }
 0x618   :  { %2206 = vadd.xlane.f32.xlu0 %v2205_v15 }
 0x6a1   :  { %v2204_v57 = vpop.xlane.xlu0 %2203 }
 0x6a2   :  { %v2232_v26 = vadd.f32 %v3496_v42, %v2204_v57 }
 0x6a4   :  { %v3554_v23 = vadd.f32 %v2232_v26, %v717_v54 }
 0x6da   :  { %v1609_v44 = vpop.f32.mrb[44].mxu0  ;;  %v1650_v45 = vpop.f32.mrb[44].mxu1 }
 0x6db   :  { %v1659_v48 = vadd.f32 %v1658_v19, %v1609_v44  ;;  %v1611_v50 = vpop.f32.mrb[45].mxu0  ;;  %v2742_v51 = vpop.f32.mrb[45].mxu1  ;;  %v1679_v39 = vadd.f32 %v3395_v34, %v1650_v45 }
 0x6dc   :  { %v1613_v56 = vpop.f32.mrb[46].mxu0  ;;  %v1653_v55 = vpop.f32.mrb[46].mxu1  ;;  %v1669_v61 = vadd.f32 %v1668_v53, %v1611_v50 }
 0x6dd   :  { %v2561_v43 = vmul.f32 -1.442695, %v1659_v48  ;;  %v1614_v52 = vpop.f32.mrb[47].mxu0  ;;  %v2743_v36 = vpop.f32.mrb[47].mxu1 }
 0x6de   :  { %v2562_v33 = vmul.f32 -1.442695, %v1669_v61 }
 0x6df   :  { %2871 = vpow2.f32 %v2561_v43  ;;  %v1836_v43 = vunpack.c.h.bf16 %v1677_v3 }
 0x6e0   :  { %2873 = vpow2.f32 %v2562_v33 }
 0x6e9   :  { %v2872_v47 = vpop.eup %2871 }
 0x6ea   :  { %v1663_v62 = vadd.f32 1.0, %v2872_v47  ;;  %v2874_v49 = vpop.eup %2873 }
 0x6eb   :  { %v1673_v63 = vadd.f32 1.0, %v2874_v49 }
 0x6ec   :  { %2875 = vrcp.f32 %v1663_v62 }
 0x6ed   :  { %2877 = vrcp.f32 %v1673_v63 }
 0x6f6   :  { %v2876_v5 = vpop.eup %2875 }
 0x6f7   :  { %v1680_v6 = vmul.f32 %v2876_v5, %v1679_v39  ;;  %v2878_v38 = vpop.eup %2877 }
 0x6f8   :  { %v1683_v10 = vsub.f32 1.0, %v2878_v38  ;;  %v1685_v60 = vmul.f32 %v2878_v38, %v3522_v9  ;;  %v2815_v9 = vld [vmem:[%s3659_s11 + $0x8] ss:$12 sps:$4 sm:$0xff]  }
 0x6f9   :  { %v1681_v7 = vadd.f32 %v1680_v6, %v1678_v41 }
 0x6fb   :  { %2879 = vtanh.f32 %v1681_v7 }
 0x705   :  { %v2880_v8 = vpop.eup %2879 }
 0x706   :  { %v1684_v11 = vmul.f32 %v2880_v8, %v1683_v10  ;;  %v2819_v8 = vld [vmem:[%s3659_s11 + $0x4] ss:$12 sps:$4 sm:$0xff]  }
 0x708   :  { %v1686_v12 = vadd.f32 %v1685_v60, %v1684_v11  ;;  %v2820_v60 = vld [vmem:[%s3659_s11 + $0x8] ss:$12 sps:$4 sm:$0xff]  }
 0x709   :  { %v2823_v11 = vld [vmem:[%s3659_s11 + $0x1c] ss:$12 sps:$4 sm:$0xff]  }
 0x70a   :  { %v1687_v27 = vpack.c.bf16 %v1686_v12, %v1686_v12 }
 0x70c   :  { %1689 = vst.msk [vmem:[#allocation5 + $0x10] sm:$0xf] %vm810_vm1, %v1687_v27  ;;  %2569 = vmatmul.mubr.msk.bf16.vlgmr.msra.gmra.mrb[48].mxu0 %vm159_vm0, %v1687_v27  ;;  %2749 = vmatmul.mubr.msk.bf16.vlgmr.msra.gmra.mrb[48].mxu1 %vm159_vm0, %v1687_v27  ;;  %v2821_v27 = vld [vmem:[%s3659_s11 + $0x18] ss:$12 sps:$4 sm:$0xff]  }
 0x70d   :  { %1892 = vmatpush1.bf16.msra.mxu0 %v3320_v16  ;;  %1923 = vmatprep.mubr.bf16.mxu0 %v2943_v2  ;;  %v1816_v16 = vunpack.c.h.bf16 %v1657_v29 }
 0x70e   :  { %1893 = vmatprep.subr.bf16.mxu0 %v3325_v21  ;;  %2756 = vmatprep.mubr.msk.bf16.mxu1 %vm2945_vm2, %v2944_v59 }
 0x70f   :  { %2753 = vmatpush3.bf16.msra.mxu1 %v2815_v9  ;;  %v1973_v9 = vld [vmem:[#allocation2 + $0x18] sm:$0xff]  }
 0x710   :  { %2754 = vmatprep.subr.bf16.mxu1 %v2944_v59 }
 0x711   :  { %1894 = vmatpush1.bf16.msra.mxu0 %v3336_v40 }
 0x712   :  { %2049 = vmatprep.subr.bf16.mxu0 %v2819_v8 }
 0x713   :  { %2755 = vmatpush3.bf16.msra.mxu1 %v2816_v32  ;;  %v1974_v32 = vunpack.c.l.bf16 %v1973_v9 }
 0x714   :  { %2760 = vmatprep.subr.bf16.mxu1 %v2944_v59 }
 0x7df   :  { %v1767_v21 = vpop.f32.mrb[48].mxu0  ;;  %v1808_v15 = vpop.f32.mrb[48].mxu1 }
 0x7e0   :  { %v1817_v22 = vadd.f32 %v1816_v16, %v1767_v21  ;;  %v1769_v40 = vpop.f32.mrb[49].mxu0  ;;  %v2750_v57 = vpop.f32.mrb[49].mxu1  ;;  %v1837_v55 = vadd.f32 %v3395_v34, %v1808_v15  ;;  %v1983_v16 = vld [vmem:[#allocation3 + $0x18] sm:$0xf] }
 0x7e1   :  { %v1827_v54 = vadd.f32 %v1826_v1, %v1769_v40  ;;  %v1771_v26 = vpop.f32.mrb[50].mxu0  ;;  %v1811_v19 = vpop.f32.mrb[50].mxu1  ;;  %v1984_v57 = vunpack.c.l.bf16 %v1983_v16 }
 0x7e2   :  { %v2571_v44 = vmul.f32 -1.442695, %v1817_v22  ;;  %v1772_v45 = vpop.f32.mrb[51].mxu0  ;;  %v2751_v48 = vpop.f32.mrb[51].mxu1 }
 0x7e3   :  { %v2572_v50 = vmul.f32 -1.442695, %v1827_v54 }
 0x7e4   :  { %2881 = vpow2.f32 %v2571_v44 }
 0x7e5   :  { %2883 = vpow2.f32 %v2572_v50 }
 0x7ee   :  { %v2882_v51 = vpop.eup %2881 }
 0x7ef   :  { %v1821_v53 = vadd.f32 1.0, %v2882_v51  ;;  %v2884_v56 = vpop.eup %2883 }
 0x7f0   :  { %v1831_v29 = vadd.f32 1.0, %v2884_v56 }
 0x7f1   :  { %2885 = vrcp.f32 %v1821_v53 }
 0x7f2   :  { %2887 = vrcp.f32 %v1831_v29  ;;  %v1993_v29 = vld [vmem:[#allocation4 + $0x18] sm:$0xff]  }
 0x7fb   :  { %v2886_v14 = vpop.eup %2885 }
 0x7fc   :  { %v1838_v52 = vmul.f32 %v2886_v14, %v1837_v55  ;;  %v2888_v61 = vpop.eup %2887 }
 0x7fd   :  { %v1841_v33 = vsub.f32 1.0, %v2888_v61  ;;  %v1843_v62 = vmul.f32 %v2888_v61, %v1686_v12  ;;  %v2824_v12 = vld [vmem:[%s3659_s11 + $0x20] ss:$12 sps:$4 sm:$0xff]  }
 0x7fe   :  { %v1839_v36 = vadd.f32 %v1838_v52, %v1836_v43  ;;  %v1994_v43 = vunpack.c.l.bf16 %v1993_v29 }
 0x800   :  { %2889 = vtanh.f32 %v1839_v36 }
 0x80a   :  { %v2890_v47 = vpop.eup %2889 }
 0x80b   :  { %v1842_v49 = vmul.f32 %v2890_v47, %v1841_v33 }
 0x80d   :  { %v3576_v63 = vadd.f32 %v1843_v62, %v1842_v49 }
 0x80f   :  { %v1845_v39 = vpack.c.bf16 %v3576_v63, %v3576_v63 }
 0x811   :  { %1847 = vst.msk [vmem:[#allocation5 + $0x14] sm:$0xf] %vm810_vm1, %v1845_v39  ;;  %2579 = vmatmul.mubr.msk.bf16.vlgmr.msra.gmra.mrb[52].mxu0 %vm159_vm0, %v1845_v39  ;;  %2757 = vmatmul.mubr.msk.bf16.vlgmr.msra.gmra.mrb[52].mxu1 %vm159_vm0, %v1845_v39 }
 0x812   :  { %2081 = vmatprep.mubr.bf16.mxu0 %v2943_v2  ;;  %2764 = vmatprep.mubr.msk.bf16.mxu1 %vm2945_vm2, %v2944_v59  ;;  %v2817_v2 = vld [vmem:[%s3659_s11] ss:$12 sps:$4 sm:$0xff]  }
 0x813   :  { %2761 = vmatpush3.bf16.msra.mxu1 %v2820_v60  ;;  %2050 = vmatpush1.bf16.msra.mxu0 %v2817_v2 }
 0x814   :  { %2762 = vmatprep.subr.bf16.mxu1 %v2944_v59  ;;  %2051 = vmatprep.subr.bf16.mxu0 %v2823_v11 }
 0x817   :  { %2763 = vmatpush3.bf16.msra.mxu1 %v2824_v12  ;;  %2052 = vmatpush1.bf16.msra.mxu0 %v2821_v27 }
 0x818   :  { %v2620_v3 = vld [vmem:[#allocation5 + $0x10] sm:$0xff]  }
 0x819   :  { %v2613_v5 = vunpack.c.l.bf16 %v2620_v3  ;;  %v2614_v41 = vunpack.c.h.bf16 %v2620_v3 }
 0x81b   :  { %v2192_v6 = vmul.f32 %v2613_v5, %v3445_v58  ;;  %v2193_v38 = vmul.f32 %v2614_v41, %v3445_v58  ;;  %v2132_v5 = vunpack.c.h.bf16 %v1973_v9  ;;  %v2141_v41 = vld [vmem:[#allocation3 + $0x1c] sm:$0xf] }
 0x81c   :  { %v2142_v8 = vunpack.c.l.bf16 %v2141_v41 }
 0x81d   :  { %v2208_v7 = vsel %vm159_vm0, %v2192_v6, 0.0  ;;  %v2211_v10 = vsel %vm159_vm0, %v2193_v38, 0.0 }
 0x81e   :  { %2209 = vadd.xlane.f32.xlu0 %v2208_v7 }
 0x822   :  { %2212 = vadd.xlane.f32.xlu0 %v2211_v10 }
 0x8e4   :  { %v1925_v21 = vpop.f32.mrb[52].mxu0  ;;  %v1966_v15 = vpop.f32.mrb[52].mxu1 }
 0x8e5   :  { %v1975_v1 = vadd.f32 %v1974_v32, %v1925_v21  ;;  %v1927_v22 = vpop.f32.mrb[53].mxu0  ;;  %v2758_v40 = vpop.f32.mrb[53].mxu1  ;;  %v1995_v55 = vadd.f32 %v3395_v34, %v1966_v15 }
 0x8e6   :  { %v1929_v54 = vpop.f32.mrb[54].mxu0  ;;  %v1969_v26 = vpop.f32.mrb[54].mxu1  ;;  %v1985_v48 = vadd.f32 %v1984_v57, %v1927_v22  ;;  %v2152_v57 = vunpack.c.h.bf16 %v1993_v29 }
 0x8e7   :  { %v2581_v19 = vmul.f32 -1.442695, %v1975_v1  ;;  %v1930_v44 = vpop.f32.mrb[55].mxu0  ;;  %v2759_v45 = vpop.f32.mrb[55].mxu1 }
 0x8e8   :  { %v2582_v59 = vmul.f32 -1.442695, %v1985_v48 }
 0x8e9   :  { %2891 = vpow2.f32 %v2581_v19 }
 0x8ea   :  { %2893 = vpow2.f32 %v2582_v59 }
 0x8f3   :  { %v2892_v50 = vpop.eup %2891 }
 0x8f4   :  { %v1979_v51 = vadd.f32 1.0, %v2892_v50  ;;  %v2894_v53 = vpop.eup %2893 }
 0x8f5   :  { %v1989_v56 = vadd.f32 1.0, %v2894_v53  ;;  %v2231_v53 = vadd.f32 %v3496_v42, %v3548_v18 }
 0x8f6   :  { %2895 = vrcp.f32 %v1979_v51 }
 0x8f7   :  { %2897 = vrcp.f32 %v1989_v56 }
 0x900   :  { %v2896_v14 = vpop.eup %2895 }
 0x901   :  { %v1996_v52 = vmul.f32 %v2896_v14, %v1995_v55  ;;  %v2898_v61 = vpop.eup %2897 }
 0x902   :  { %v1999_v33 = vsub.f32 1.0, %v2898_v61  ;;  %v2001_v62 = vmul.f32 %v2898_v61, %v3576_v63 }
 0x903   :  { %v1997_v36 = vadd.f32 %v1996_v52, %v1994_v43  ;;  %v716_v43 = vmul.f32 0.125, %v3550_v31 }
 0x905   :  { %2899 = vtanh.f32 %v1997_v36  ;;  %v2239_v36 = vadd.f32 %v2231_v53, %v716_v43 }
 0x90f   :  { %v2900_v47 = vpop.eup %2899 }
 0x910   :  { %v2000_v49 = vmul.f32 %v2900_v47, %v1999_v33 }
 0x912   :  { %v2002_v39 = vadd.f32 %v2001_v62, %v2000_v49  ;;  %v719_v62 = vmul.f32 0.125, %v3488_v28  ;;  %v2596_v49 = vmul.f32 -1.442695, %v2239_v36 }
 0x914   :  { %v2003_v3 = vpack.c.bf16 %v2002_v39, %v2002_v39 }
 0x916   :  { %2005 = vst.msk [vmem:[#allocation5 + $0x18] sm:$0xf] %vm810_vm1, %v2003_v3  ;;  %2589 = vmatmul.mubr.msk.bf16.vlgmr.msra.gmra.mrb[56].mxu0 %vm159_vm0, %v2003_v3  ;;  %2765 = vmatmul.mubr.msk.bf16.vlgmr.msra.gmra.mrb[56].mxu1 %vm159_vm0, %v2003_v3 }
 0x9e9   :  { %v2083_v6 = vpop.f32.mrb[56].mxu0  ;;  %v2124_v7 = vpop.f32.mrb[56].mxu1 }
 0x9ea   :  { %v2133_v38 = vadd.f32 %v2132_v5, %v2083_v6  ;;  %v2085_v10 = vpop.f32.mrb[57].mxu0  ;;  %v2766_v2 = vpop.f32.mrb[57].mxu1  ;;  %v2153_v22 = vadd.f32 %v3395_v34, %v2124_v7 }
 0x9eb   :  { %v2087_v60 = vpop.f32.mrb[58].mxu0  ;;  %v2127_v11 = vpop.f32.mrb[58].mxu1  ;;  %v2143_v32 = vadd.f32 %v2142_v8, %v2085_v10 }
 0x9ec   :  { %v2591_v63 = vmul.f32 -1.442695, %v2133_v38  ;;  %v2088_v12 = vpop.f32.mrb[59].mxu0  ;;  %v2767_v27 = vpop.f32.mrb[59].mxu1 }
 0x9ed   :  { %v2592_v16 = vmul.f32 -1.442695, %v2143_v32  ;;  %v2207_v34 = vpop.xlane.xlu0 %2206  ;;  %v2595_v12 = vmul.f32 -1.442695, %v3499_v46  ;;  %v2597_v27 = vmul.f32 -1.442695, %v3554_v23 }
 0x9ee   :  { %2901 = vpow2.f32 %v2591_v63 }
 0x9ef   :  { %2903 = vpow2.f32 %v2592_v16 }
 0x9f1   :  { %v2210_v29 = vpop.xlane.xlu0 %2209 }
 0x9f2   :  { %v2234_v61 = vadd.f32 %v3496_v42, %v2210_v29 }
 0x9f4   :  { %v2242_v18 = vadd.f32 %v2234_v61, %v719_v62 }
 0x9f5   :  { %v2213_v63 = vpop.xlane.xlu0 %2212 }
 0x9f6   :  { %v2599_v3 = vmul.f32 -1.442695, %v2242_v18  ;;  %v2235_v32 = vadd.f32 %v3496_v42, %v2213_v63 }
 0x9f8   :  { %v2902_v21 = vpop.eup %2901 }
 0x9f9   :  { %v2137_v15 = vadd.f32 1.0, %v2902_v21  ;;  %v2904_v9 = vpop.eup %2903 }
 0x9fa   :  { %v2147_v1 = vadd.f32 1.0, %v2904_v9 }
 0x9fb   :  { %2905 = vrcp.f32 %v2137_v15 }
 0x9fc   :  { %2907 = vrcp.f32 %v2147_v1 }
 0xa05   :  { %v2906_v40 = vpop.eup %2905 }
 0xa06   :  { %v2154_v54 = vmul.f32 %v2906_v40, %v2153_v22  ;;  %v2908_v19 = vpop.eup %2907 }
 0xa07   :  { %v2157_v44 = vsub.f32 1.0, %v2908_v19  ;;  %v2159_v59 = vmul.f32 %v2908_v19, %v2002_v39 }
 0xa08   :  { %v2155_v26 = vadd.f32 %v2154_v54, %v2152_v57  ;;  %v721_v54 = vmul.f32 0.125, %v3492_v35 }
 0xa0a   :  { %2909 = vtanh.f32 %v2155_v26 }
 0xa0b   :  { %2911 = vpow2.f32 %v2596_v49 }
 0xa0c   :  { %2913 = vpow2.f32 %v2599_v3 }
 0xa14   :  { %v2910_v45 = vpop.eup %2909 }
 0xa15   :  { %v2158_v48 = vmul.f32 %v2910_v45, %v2157_v44  ;;  %v2912_v31 = vpop.eup %2911  ;;  %v722_v45 = vmul.f32 0.125, %v3494_v37 }
 0xa16   :  { %v2271_v5 = vadd.f32 1.0, %v2912_v31  ;;  %v2914_v41 = vpop.eup %2913 }
 0xa17   :  { %v2160_v50 = vadd.f32 %v2159_v59, %v2158_v48  ;;  %v2274_v6 = vadd.f32 1.0, %v2914_v41 }
 0xa18   :  { %2915 = vrcp.f32 %v2271_v5 }
 0xa19   :  { %v2161_v51 = vpack.c.bf16 %v2160_v50, %v2160_v50  ;;  %2164 = vst.msk [vmem:[%s3668_s19] sm:$0xff] %vm159_vm0, %v2160_v50  ;;  %2917 = vrcp.f32 %v2274_v6 }
 0xa1a   :  { %2919 = vpow2.f32 %v2595_v12 }
 0xa1b   :  { %2163 = vst.msk [vmem:[#allocation5 + $0x1c] sm:$0xf] %vm810_vm1, %v2161_v51  ;;  %2921 = vpow2.f32 %v2597_v27 }
 0xa22   :  { %v2621_v56 = vld [vmem:[#allocation5 + $0x18] sm:$0xff]   ;;  %v2916_v28 = vpop.eup %2915 }
 0xa23   :  { %v2617_v55 = vunpack.c.l.bf16 %v2621_v56  ;;  %v2618_v14 = vunpack.c.h.bf16 %v2621_v56  ;;  %v2918_v10 = vpop.eup %2917 }
 0xa24   :  { %v2920_v9 = vpop.eup %2919 }
 0xa25   :  { %v2194_v52 = vmul.f32 %v2617_v55, %v3445_v58  ;;  %v2195_v47 = vmul.f32 %v2618_v14, %v3445_v58  ;;  %v2308_v58 = vpop.permute.xlu1 %2307  ;;  %v2922_v1 = vpop.eup %2921  ;;  %v2270_v22 = vadd.f32 1.0, %v2920_v9 }
 0xa26   :  { %v2360_v38 = vmul.f32 %v2916_v28, %v2308_v58  ;;  %v2272_v46 = vadd.f32 1.0, %v2922_v1 }
 0xa27   :  { %v2214_v33 = vsel %vm159_vm0, %v2194_v52, 0.0  ;;  %v2217_v39 = vsel %vm159_vm0, %v2195_v47, 0.0 }
 0xa28   :  { %2215 = vadd.xlane.f32.xlu0 %v2214_v33  ;;  %v2368_v8 = vadd.f32 1e-06, %v2360_v38 }
 0xa29   :  { %v2315_v7 = vpop.permute.xlu1 %2314 }
 0xa2c   :  { %2218 = vadd.xlane.f32.xlu0 %v2217_v39 }
 0xa2d   :  { %v2329_v2 = vpop.permute.xlu1 %2328 }
 0xa2e   :  { %v2363_v60 = vmul.f32 %v2918_v10, %v2329_v2  ;;  %v2408_v2 = vand.u32 127, %v723_v0 }
 0xa30   :  { %v2371_v11 = vadd.f32 1e-06, %v2363_v60 }
 0xa31   :  { %v2343_v3 = vpop.permute.xlu1 %2342 }
 0xa42   :  { %2300 = vbcast.lane.b32.xlu0 %v3080_v13, 256  ;;  %v2233_v13 = vadd.f32 %v3496_v42, %v2207_v34 }
 0xa46   :  { %2321 = vbcast.lane.b32.xlu0 %v3096_v20, 256  ;;  %v718_v20 = vmul.f32 0.125, %v3486_v24 }
 0xa4a   :  { %2335 = vbcast.lane.b32.xlu0 %v3113_v25, 256  ;;  %v2241_v25 = vadd.f32 %v2233_v13, %v718_v20 }
 0xa4c   :  { %v2598_v16 = vmul.f32 -1.442695, %v2241_v25 }
 0xa4e   :  { %2349 = vbcast.lane.b32.xlu0 %v3132_v30, 256  ;;  %v720_v30 = vmul.f32 0.125, %v3490_v17  ;;  %2923 = vpow2.f32 %v2598_v16 }
 0xa50   :  { %v2243_v21 = vadd.f32 %v2235_v32, %v720_v30 }
 0xa52   :  { %2387 = vperm.xlu0 %2772, %v2368_v8   ;;  %v2600_v15 = vmul.f32 -1.442695, %v2243_v21 }
 0xa54   :  { %2925 = vpow2.f32 %v2600_v15 }
 0xa55   :  { %2927 = vrcp.f32 %v2270_v22 }
 0xa56   :  { %2396 = vperm.xlu0 %2772, %v2371_v11   ;;  %2929 = vrcp.f32 %v2272_v46  ;;  %v2411_v11 = vsub.s32 %v2408_v2, %v3060_v4 }
 0xa58   :  { %v2924_v40 = vpop.eup %2923 }
 0xa59   :  { %v2273_v24 = vadd.f32 1.0, %v2924_v40 }
 0xa5b   :  { %2931 = vrcp.f32 %v2273_v24 }
 0xa5e   :  { %v2926_v57 = vpop.eup %2925 }
 0xa5f   :  { %v2275_v19 = vadd.f32 1.0, %v2926_v57  ;;  %v2928_v50 = vpop.eup %2927 }
 0xa60   :  { %v2930_v34 = vpop.eup %2929 }
 0xa61   :  { %v2361_v35 = vmul.f32 %v2930_v34, %v2315_v7 }
 0xa63   :  { %v2369_v52 = vadd.f32 1e-06, %v2361_v35 }
 0xa65   :  { %v2932_v43 = vpop.eup %2931 }
 0xab5   :  { %v2216_v23 = vpop.xlane.xlu0 %2215 }
 0xab6   :  { %v2236_v17 = vadd.f32 %v3496_v42, %v2216_v23 }
 0xab8   :  { %v2244_v26 = vadd.f32 %v2236_v17, %v721_v54 }
 0xab9   :  { %v2219_v44 = vpop.xlane.xlu0 %2218 }
 0xaba   :  { %v2601_v48 = vmul.f32 -1.442695, %v2244_v26  ;;  %v2237_v59 = vadd.f32 %v3496_v42, %v2219_v44 }
 0xabc   :  { %2933 = vpow2.f32 %v2601_v48  ;;  %v2245_v51 = vadd.f32 %v2237_v59, %v722_v45 }
 0xabd   :  { %2935 = vrcp.f32 %v2275_v19  ;;  %v2301_v53 = vpop.permute.xlu0 %2300 }
 0xabe   :  { %v2602_v56 = vmul.f32 -1.442695, %v2245_v51  ;;  %v2359_v29 = vmul.f32 %v2928_v50, %v2301_v53 }
 0xac0   :  { %2937 = vpow2.f32 %v2602_v56  ;;  %v2367_v55 = vadd.f32 1e-06, %v2359_v29 }
 0xac1   :  { %v2322_v14 = vpop.permute.xlu0 %2321 }
 0xac2   :  { %2384 = vperm.xlu1 %2771, %v2367_v55   ;;  %v2362_v36 = vmul.f32 %v2932_v43, %v2322_v14 }
 0xac4   :  { %v2370_v47 = vadd.f32 1e-06, %v2362_v36 }
 0xac5   :  { %v2336_v37 = vpop.permute.xlu0 %2335 }
 0xac6   :  { %v2934_v61 = vpop.eup %2933  ;;  %2390 = vperm.xlu1 %2771, %v2369_v52  }
 0xac7   :  { %v2936_v42 = vpop.eup %2935  ;;  %v2276_v33 = vadd.f32 1.0, %v2934_v61 }
 0xac8   :  { %v2364_v62 = vmul.f32 %v2936_v42, %v2336_v37 }
 0xac9   :  { %2939 = vrcp.f32 %v2276_v33  ;;  %v2350_v58 = vpop.permute.xlu0 %2349 }
 0xaca   :  { %v2938_v49 = vpop.eup %2937  ;;  %2393 = vperm.xlu1 %2771, %v2370_v47   ;;  %v2372_v39 = vadd.f32 1e-06, %v2364_v62 }
 0xacb   :  { %v2277_v18 = vadd.f32 1.0, %v2938_v49 }
 0xacd   :  { %2941 = vrcp.f32 %v2277_v18 }
 0xace   :  { %2399 = vperm.xlu1 %2771, %v2372_v39  }
 0xad1   :  { %v2388_v8 = vpop.permute.xlu0 %2387 }
 0xad2   :  { %v2416_v20 = vrot.slane %v2388_v8, %v2411_v11 }
 0xad3   :  { %v2940_v31 = vpop.eup %2939 }
 0xad4   :  { %v2365_v5 = vmul.f32 %v2940_v31, %v2343_v3 }
 0xad5   :  { %v2397_v63 = vpop.permute.xlu0 %2396 }
 0xad6   :  { %v2373_v41 = vadd.f32 1e-06, %v2365_v5  ;;  %v2428_v0 = vrot.slane %v2397_v63, %v2411_v11 }
 0xad7   :  { %v2942_v6 = vpop.eup %2941 }
 0xad8   :  { %v2366_v28 = vmul.f32 %v2942_v6, %v2350_v58  ;;  %2402 = vperm.xlu0 %2772, %v2373_v41  }
 0xada   :  { %v2374_v7 = vadd.f32 1e-06, %v2366_v28 }
 0xadc   :  { %2405 = vperm.xlu1 %2771, %v2374_v7  }
 0xb41   :  { %v2385_v38 = vpop.permute.xlu1 %2384 }
 0xb42   :  { %v2412_v13 = vrot.slane %v2385_v38, %v2411_v11 }
 0xb44   :  { %v2442_v32 = vsel %vm2441_vm4, %v2416_v20, %v2412_v13 }
 0xb45   :  { %v2391_v10 = vpop.permute.xlu1 %2390 }
 0xb46   :  { %v2420_v12 = vrot.slane %v2391_v10, %v2411_v11 }
 0xb48   :  { %v2444_v30 = vsel %vm2443_vm5, %v2420_v12, %v2442_v32 }
 0xb49   :  { %v2394_v60 = vpop.permute.xlu1 %2393 }
 0xb4a   :  { %v2424_v27 = vrot.slane %v2394_v60, %v2411_v11 }
 0xb4c   :  { %v2446_v21 = vsel %vm2445_vm6, %v2424_v27, %v2444_v30 }
 0xb4d   :  { %v2400_v25 = vpop.permute.xlu1 %2399  ;;  %v2448_v4 = vsel %vm2447_vm7, %v2428_v0, %v2446_v21 }
 0xb4e   :  { %v2432_v15 = vrot.slane %v2400_v25, %v2411_v11 }
 0xb50   :  { %v2450_v22 = vsel %vm2449_vm8, %v2432_v15, %v2448_v4 }
 0xb57   :  { %v2403_v16 = vpop.permute.xlu0 %2402 }
 0xb58   :  { %v2436_v9 = vrot.slane %v2403_v16, %v2411_v11 }
 0xb5a   :  { %v2452_v40 = vsel %vm2451_vm9, %v2436_v9, %v2450_v22 }
 0xb5b   :  { %v2406_v1 = vpop.permute.xlu1 %2405 }
 0xb5c   :  { %v2440_v46 = vrot.slane %v2406_v1, %v2411_v11 }
 0xb5e   :  { %v2454_v24 = vsel %vm2453_vm10, %v2440_v46, %v2452_v40 }
 0xb5f   :  { %2456 = vst.msk [vmem:[%s3669_s18] sm:$0xff] %vm670_vm3, %v2454_v24 }

</bundles_post_ra>
